<compile_context>
chip_gen: v7x
topology: tpu7x:2x2x1
jax: 0.10.0
libtpu: 0.0.40
codegen_flags: <defaults>
</compile_context>

<pallas_src>
import functools

import jax
import jax.numpy as jnp
import numpy as np
from jax import lax
from jax.experimental import pallas as pl
from jax.experimental.pallas import tpu as pltpu

MAX_DISP = 21
_LANE = 128   # lane width / alignment target
_TH = 8       # row-strip height (sublane-aligned)


def _occlu_mask_kernel(sgn_ref, disp_ref, out_ref, s_ref, *, H, W, max_disp):
    """One (H, W) disparity block -> one (H, W) occlusion-mask block."""
    n = pl.program_id(0)
    sgn = sgn_ref[n]            # -1 -> 'l' branch, +1 -> 'r' branch, 0 -> zeros
    padw = max_disp + 1         # 22: replication-pad width on the occluded side
    c0 = _LANE                  # data columns start 128-aligned in scratch
    We = W + padw               # extended width each strip reads

    @pl.when(sgn == 0)
    def _zero():
        out_ref[...] = jnp.zeros_like(out_ref)

    @pl.when(sgn != 0)
    def _compute():
        # ---- prologue: vertical 3-row sum S built directly in scratch -------
        # (three overlapping row slices of the input block; only the first/last
        #  row are duplicated -- no raw padded slab, no full-image copy.)
        if H >= 3:
            s_ref[1:H - 1, c0:c0 + W] = (disp_ref[0:H - 2, :]
                                         + disp_ref[1:H - 1, :]
                                         + disp_ref[2:H, :])
        if H >= 2:
            s_ref[0:1, c0:c0 + W] = 2.0 * disp_ref[0:1, :] + disp_ref[1:2, :]
            s_ref[H - 1:H, c0:c0 + W] = (disp_ref[H - 2:H - 1, :]
                                         + 2.0 * disp_ref[H - 1:H, :])
        else:
            s_ref[0:1, c0:c0 + W] = 3.0 * disp_ref[0:1, :]

        # Replication pad of S on both sides (cheap, one-shot); each branch
        # only ever reads its own side plus the data columns, all initialized.
        edge_l = s_ref[:, c0:c0 + 1]
        edge_r = s_ref[:, c0 + W - 1:c0 + W]
        s_ref[:, c0 - padw:c0] = jnp.broadcast_to(edge_l, (H, padw))
        s_ref[:, c0 + W:c0 + W + padw] = jnp.broadcast_to(edge_r, (H, padw))

        # Loop-invariant column terms (hoisted: broadcast_in_dim is not CSE'd).
        cof_e = 3.0 * lax.broadcasted_iota(jnp.int32, (1, We), 1).astype(jnp.float32)
        cof_w = 3.0 * lax.broadcasted_iota(jnp.int32, (1, W), 1).astype(jnp.float32)
        cof_e_r = 3.0 * padw - cof_e

        inv3 = 1.0 / 3.0

        def strip(r0, th):
            rows = pl.ds(r0, th)

            # 'l' branch:  3*o_i = K + hh[x+i+2],  hh[j] = 3j - S[c0+j],
            #              K[x] = (S[c0+x]+S[c0+x+1])/2 - 3x - 3
            @pl.when(sgn < 0)
            def _l():
                s = s_ref[rows, c0:c0 + We]                      # (th, We), aligned
                hh = cof_e - s
                base3 = (s[:, 0:W] + s[:, 1:W + 1]) * 0.5
                k = base3 - cof_w - 3.0
                m3 = jnp.abs(k + hh[:, 2:2 + W])                 # filter i = 0
                for i in range(1, max_disp):                     # 3 VALU ops/filter
                    m3 = jnp.minimum(m3, jnp.abs(k + hh[:, i + 2:i + 2 + W]))
                out_ref[rows, :] = jnp.minimum(m3 * inv3, 1.0).astype(out_ref.dtype)

            # 'r' branch on the un-flipped map (mirrored offsets, no flips):
            #   3*o_i = K_r + hh_r[x+padw-2-i],  hh_r[j] = 3*padw - 3j - S,
            #   K_r[x] = (S[c0+x]+S[c0+x-1])/2 + 3x - 3
            @pl.when(sgn > 0)
            def _r():
                s = s_ref[rows, c0 - padw:c0 - padw + We]        # (th, We)
                hh = cof_e_r - s
                base3 = (s[:, padw:padw + W] + s[:, padw - 1:padw - 1 + W]) * 0.5
                k = base3 + cof_w - 3.0
                j0 = padw - 2
                m3 = jnp.abs(k + hh[:, j0:j0 + W])               # filter i = 0
                for i in range(1, max_disp):
                    m3 = jnp.minimum(m3, jnp.abs(k + hh[:, j0 - i:j0 - i + W]))
                out_ref[rows, :] = jnp.minimum(m3 * inv3, 1.0).astype(out_ref.dtype)

        n_full = H // _TH
        rem = H - n_full * _TH
        if n_full > 0:
            def body(t, carry):
                strip(pl.multiple_of(t * _TH, _TH), _TH)
                return carry
            lax.fori_loop(0, n_full, body, 0)
        if rem > 0:                                              # static tail strip
            strip(n_full * _TH, rem)


def self_occlu_mask(dispmap, bsline, max_disp=MAX_DISP):
    """Pallas implementation of SelfOccluMask.forward."""
    N, C, H, W = dispmap.shape
    assert C == 1, "SelfOccluMask expects a single-channel disparity map"
    dispmap = dispmap.astype(jnp.float32)
    sgn = jnp.sign(jnp.asarray(bsline, jnp.float32)).astype(jnp.int32).reshape(N)

    # Lane-align: pad W up to a multiple of 128 with edge replication.  For the
    # surviving columns this matches ReplicationPad2d exactly, so the crop at
    # the end restores the module's semantics bit-for-bit (up to f32 rounding).
    Wp = ((W + _LANE - 1) // _LANE) * _LANE
    x = dispmap
    if Wp != W:
        x = jnp.pad(x, ((0, 0), (0, 0), (0, 0), (0, Wp - W)), mode="edge")

    padw = max_disp + 1
    c0 = _LANE
    Wsc = c0 + ((Wp + padw + _LANE - 1) // _LANE) * _LANE        # scratch width

    kernel = functools.partial(_occlu_mask_kernel, H=H, W=Wp, max_disp=max_disp)

    # in/out blocks are double-buffered by the pipeliner; scratch is single.
    vmem_bytes = 4 * (4 * H * Wp + H * Wsc) + (8 << 20)
    vmem_bytes = int(max(vmem_bytes, 16 << 20))

    out = pl.pallas_call(
        kernel,
        out_shape=jax.ShapeDtypeStruct((N, 1, H, Wp), jnp.float32),
        grid_spec=pltpu.PrefetchScalarGridSpec(
            num_scalar_prefetch=1,
            grid=(N,),
            in_specs=[pl.BlockSpec((None, None, H, Wp), lambda n, sgn_r: (n, 0, 0, 0))],
            out_specs=pl.BlockSpec((None, None, H, Wp), lambda n, sgn_r: (n, 0, 0, 0)),
            scratch_shapes=[pltpu.VMEM((H, Wsc), jnp.float32)],
        ),
        compiler_params=pltpu.CompilerParams(
            dimension_semantics=("parallel",),
            vmem_limit_bytes=vmem_bytes,
        ),
    )(sgn, x)

    if Wp != W:
        out = out[:, :, :, :W]
    return out


def _reference(dispmap, bsline, max_disp=MAX_DISP):
    """Pure-JAX reference using an explicit conv with the module's weights."""
    w = np.zeros((max_disp, 1, 3, max_disp + 2), np.float32)
    for i in range(max_disp):
        w[i, 0, :, 0:2] = 1.0 / 6.0
        w[i, 0, :, i + 2] = -1.0 / 3.0
    w = jnp.asarray(w)
    b = jnp.arange(1, max_disp + 1, dtype=jnp.float32)

    def compute(d):
        pad = jnp.pad(d, ((0, 0), (0, 0), (1, 1), (0, max_disp + 1)), mode="edge")
        out = jax.lax.conv_general_dilated(
            pad, w, (1, 1), "VALID", dimension_numbers=("NCHW", "OIHW", "NCHW"))
        out = jnp.abs(out + b.reshape(1, -1, 1, 1))
        return jnp.clip(jnp.min(out, axis=1, keepdims=True), 0.0, 1.0)

    maskl = compute(dispmap)
    maskr = jnp.flip(compute(jnp.flip(dispmap, 3)), 3)
    bs = bsline.reshape(-1, 1, 1, 1)
    return jnp.where(bs < 0, maskl, jnp.where(bs > 0, maskr, 0.0))


if __name__ == "__main__":
    key = jax.random.PRNGKey(0)
    k1, k2 = jax.random.split(key)

    # Case 1: lane-misaligned W (exercises pad-and-crop) + strip remainder rows.
    N, H, W = 3, 20, 16
    dispmap = jax.random.uniform(k1, (N, 1, H, W), jnp.float32) * 8.0
    # One left-baseline, one right-baseline, one zero-baseline sample.
    bsline = jnp.array([-0.15, 0.3, 0.0], dtype=jnp.float32)
    out = jax.block_until_ready(self_occlu_mask(dispmap, bsline))
    ref = jax.block_until_ready(_reference(dispmap, bsline))
    np.testing.assert_allclose(np.asarray(out), np.asarray(ref), rtol=1e-5, atol=1e-4)

    # Case 2: lane-aligned W, H an exact multiple of the strip height.
    N2, H2, W2 = 2, 16, 128
    dispmap2 = jax.random.uniform(k2, (N2, 1, H2, W2), jnp.float32) * 8.0
    bsline2 = jnp.array([0.2, -0.4], dtype=jnp.float32)
    out2 = jax.block_until_ready(self_occlu_mask(dispmap2, bsline2))
    ref2 = jax.block_until_ready(_reference(dispmap2, bsline2))
    np.testing.assert_allclose(np.asarray(out2), np.asarray(ref2), rtol=1e-5, atol=1e-4)

    print("KERNEL_OK")
</pallas_src>

<mosaic_0001>
module attributes {stable_mosaic.version = 11 : i64} {
  func.func @_occlu_mask_kernel(%arg0: i32, %arg1: memref<3xi32, #tpu.memory_space<smem>>, %arg2: memref<1x1x20x128xf32, #tpu.memory_space<vmem>>, %arg3: memref<1x1x20x128xf32, #tpu.memory_space<vmem>>, %arg4: memref<20x384xf32, #tpu.memory_space<vmem>>) attributes {dimension_semantics = [#tpu.dimension_semantics<parallel>], iteration_bounds = array<i64: 3>, scalar_prefetch = 1 : i64, scratch_operands = 1 : i64, tpu.core_type = #tpu.core_type<tc>, window_params = [{transform_indices = @transform_0, window_bounds = array<i64: 1, 1, 20, 128>}, {transform_indices = @transform_1, window_bounds = array<i64: 1, 1, 20, 128>}]} {
    %0 = arith.index_cast %arg0 : i32 to index
    %1 = memref.load %arg1[%0] : memref<3xi32, #tpu.memory_space<smem>>
    %c0_i32 = arith.constant 0 : i32
    %2 = arith.cmpi eq, %1, %c0_i32 : i32
    %3 = arith.extui %2 : i1 to i32
    %c0_i32_0 = arith.constant 0 : i32
    %4 = arith.cmpi ne, %3, %c0_i32_0 : i32
    scf.if %4 {
      %cst = arith.constant 0.000000e+00 : f32
      %8 = vector.broadcast %cst : f32 to vector<20x128xf32>
      %c0 = arith.constant 0 : index
      %c0_3 = arith.constant 0 : index
      %c0_4 = arith.constant 0 : index
      %c0_5 = arith.constant 0 : index
      %9 = vector.load %arg3[%c0, %c0_3, %c0_4, %c0_5] : memref<1x1x20x128xf32, #tpu.memory_space<vmem>>, vector<1x1x20x128xf32>
      %10 = vector.shape_cast %9 : vector<1x1x20x128xf32> to vector<20x128xf32>
      %11 = vector.shape_cast %8 : vector<20x128xf32> to vector<1x1x20x128xf32>
      tpu.vector_store %arg3[%c0, %c0_3, %c0_4, %c0_5], %11 {strides = array<i32>} : memref<1x1x20x128xf32, #tpu.memory_space<vmem>>, vector<1x1x20x128xf32>,
    } else {
    }
    %c0_i32_1 = arith.constant 0 : i32
    %5 = arith.cmpi ne, %1, %c0_i32_1 : i32
    %6 = arith.extui %5 : i1 to i32
    %c0_i32_2 = arith.constant 0 : i32
    %7 = arith.cmpi ne, %6, %c0_i32_2 : i32
    scf.if %7 {
      %c0 = arith.constant 0 : index
      %c0_3 = arith.constant 0 : index
      %c0_4 = arith.constant 0 : index
      %c0_5 = arith.constant 0 : index
      %8 = vector.load %arg2[%c0, %c0_3, %c0_4, %c0_5] : memref<1x1x20x128xf32, #tpu.memory_space<vmem>>, vector<1x1x18x128xf32>
      %9 = vector.shape_cast %8 : vector<1x1x18x128xf32> to vector<18x128xf32>
      %c0_6 = arith.constant 0 : index
      %c0_7 = arith.constant 0 : index
      %c1 = arith.constant 1 : index
      %c0_8 = arith.constant 0 : index
      %10 = vector.load %arg2[%c0_6, %c0_7, %c1, %c0_8] : memref<1x1x20x128xf32, #tpu.memory_space<vmem>>, vector<1x1x18x128xf32>
      %11 = vector.shape_cast %10 : vector<1x1x18x128xf32> to vector<18x128xf32>
      %12 = arith.addf %9, %11 : vector<18x128xf32>
      %c0_9 = arith.constant 0 : index
      %c0_10 = arith.constant 0 : index
      %c2 = arith.constant 2 : index
      %c0_11 = arith.constant 0 : index
      %13 = vector.load %arg2[%c0_9, %c0_10, %c2, %c0_11] : memref<1x1x20x128xf32, #tpu.memory_space<vmem>>, vector<1x1x18x128xf32>
      %14 = vector.shape_cast %13 : vector<1x1x18x128xf32> to vector<18x128xf32>
      %15 = arith.addf %12, %14 : vector<18x128xf32>
      %c1_12 = arith.constant 1 : index
      %c128 = arith.constant 128 : index
      %16 = vector.load %arg4[%c1_12, %c128] : memref<20x384xf32, #tpu.memory_space<vmem>>, vector<18x128xf32>
      tpu.vector_store %arg4[%c1_12, %c128], %15 {strides = array<i32>} : memref<20x384xf32, #tpu.memory_space<vmem>>, vector<18x128xf32>,
      %c0_13 = arith.constant 0 : index
      %c0_14 = arith.constant 0 : index
      %c0_15 = arith.constant 0 : index
      %c0_16 = arith.constant 0 : index
      %17 = vector.load %arg2[%c0_13, %c0_14, %c0_15, %c0_16] : memref<1x1x20x128xf32, #tpu.memory_space<vmem>>, vector<1x1x1x128xf32>
      %18 = vector.shape_cast %17 : vector<1x1x1x128xf32> to vector<1x128xf32>
      %cst = arith.constant 2.000000e+00 : f32
      %19 = vector.broadcast %cst : f32 to vector<1x128xf32>
      %20 = arith.mulf %19, %18 : vector<1x128xf32>
      %c0_17 = arith.constant 0 : index
      %c0_18 = arith.constant 0 : index
      %c1_19 = arith.constant 1 : index
      %c0_20 = arith.constant 0 : index
      %21 = vector.load %arg2[%c0_17, %c0_18, %c1_19, %c0_20] : memref<1x1x20x128xf32, #tpu.memory_space<vmem>>, vector<1x1x1x128xf32>
      %22 = vector.shape_cast %21 : vector<1x1x1x128xf32> to vector<1x128xf32>
      %23 = arith.addf %20, %22 : vector<1x128xf32>
      %c0_21 = arith.constant 0 : index
      %c128_22 = arith.constant 128 : index
      %24 = vector.load %arg4[%c0_21, %c128_22] : memref<20x384xf32, #tpu.memory_space<vmem>>, vector<1x128xf32>
      tpu.vector_store %arg4[%c0_21, %c128_22], %23 {strides = array<i32>} : memref<20x384xf32, #tpu.memory_space<vmem>>, vector<1x128xf32>,
      %c0_23 = arith.constant 0 : index
      %c0_24 = arith.constant 0 : index
      %c18 = arith.constant 18 : index
      %c0_25 = arith.constant 0 : index
      %25 = vector.load %arg2[%c0_23, %c0_24, %c18, %c0_25] : memref<1x1x20x128xf32, #tpu.memory_space<vmem>>, vector<1x1x1x128xf32>
      %26 = vector.shape_cast %25 : vector<1x1x1x128xf32> to vector<1x128xf32>
      %c0_26 = arith.constant 0 : index
      %c0_27 = arith.constant 0 : index
      %c19 = arith.constant 19 : index
      %c0_28 = arith.constant 0 : index
      %27 = vector.load %arg2[%c0_26, %c0_27, %c19, %c0_28] : memref<1x1x20x128xf32, #tpu.memory_space<vmem>>, vector<1x1x1x128xf32>
      %28 = vector.shape_cast %27 : vector<1x1x1x128xf32> to vector<1x128xf32>
      %cst_29 = arith.constant 2.000000e+00 : f32
      %29 = vector.broadcast %cst_29 : f32 to vector<1x128xf32>
      %30 = arith.mulf %29, %28 : vector<1x128xf32>
      %31 = arith.addf %26, %30 : vector<1x128xf32>
      %c19_30 = arith.constant 19 : index
      %c128_31 = arith.constant 128 : index
      %32 = vector.load %arg4[%c19_30, %c128_31] : memref<20x384xf32, #tpu.memory_space<vmem>>, vector<1x128xf32>
      tpu.vector_store %arg4[%c19_30, %c128_31], %31 {strides = array<i32>} : memref<20x384xf32, #tpu.memory_space<vmem>>, vector<1x128xf32>,
      %c0_32 = arith.constant 0 : index
      %c128_33 = arith.constant 128 : index
      %33 = vector.load %arg4[%c0_32, %c128_33] : memref<20x384xf32, #tpu.memory_space<vmem>>, vector<20x1xf32>
      %c0_34 = arith.constant 0 : index
      %c255 = arith.constant 255 : index
      %34 = vector.load %arg4[%c0_34, %c255] : memref<20x384xf32, #tpu.memory_space<vmem>>, vector<20x1xf32>
      %35 = vector.shape_cast %33 : vector<20x1xf32> to vector<20x1xf32>
      %36 = vector.broadcast %35 : vector<20x1xf32> to vector<20x22xf32>
      %c0_35 = arith.constant 0 : index
      %c106 = arith.constant 106 : index
      %37 = vector.load %arg4[%c0_35, %c106] : memref<20x384xf32, #tpu.memory_space<vmem>>, vector<20x22xf32>
      tpu.vector_store %arg4[%c0_35, %c106], %36 {strides = array<i32>} : memref<20x384xf32, #tpu.memory_space<vmem>>, vector<20x22xf32>,
      %38 = vector.shape_cast %34 : vector<20x1xf32> to vector<20x1xf32>
      %39 = vector.broadcast %38 : vector<20x1xf32> to vector<20x22xf32>
      %c0_36 = arith.constant 0 : index
      %c256 = arith.constant 256 : index
      %40 = vector.load %arg4[%c0_36, %c256] : memref<20x384xf32, #tpu.memory_space<vmem>>, vector<20x22xf32>
      tpu.vector_store %arg4[%c0_36, %c256], %39 {strides = array<i32>} : memref<20x384xf32, #tpu.memory_space<vmem>>, vector<20x22xf32>,
      %41 = tpu.iota {dimensions = array<i32: 1>} : vector<1x150xi32>
      %42 = arith.sitofp %41 : vector<1x150xi32> to vector<1x150xf32>
      %cst_37 = arith.constant 3.000000e+00 : f32
      %43 = vector.broadcast %cst_37 : f32 to vector<1x150xf32>
      %44 = arith.mulf %43, %42 : vector<1x150xf32>
      %45 = tpu.iota {dimensions = array<i32: 1>} : vector<1x128xi32>
      %46 = arith.sitofp %45 : vector<1x128xi32> to vector<1x128xf32>
      %cst_38 = arith.constant 3.000000e+00 : f32
      %47 = vector.broadcast %cst_38 : f32 to vector<1x128xf32>
      %48 = arith.mulf %47, %46 : vector<1x128xf32>
      %cst_39 = arith.constant 6.600000e+01 : f32
      %49 = vector.broadcast %cst_39 : f32 to vector<1x150xf32>
      %50 = arith.subf %49, %44 : vector<1x150xf32>
      %c0_i32_40 = arith.constant 0 : i32
      %c2_i32 = arith.constant 2 : i32
      %51 = arith.addi %c0_i32_40, %c2_i32 : i32
      %c1_i32 = arith.constant 1 : i32
      scf.for %arg5 = %c0_i32_40 to %51 step %c1_i32  : i32 {
        %c8_i32 = arith.constant 8 : i32
        %58 = arith.muli %arg5, %c8_i32 : i32
        %59 = tpu.assume_multiple %58, 8 : i32
        %c0_i32_46 = arith.constant 0 : i32
        %60 = arith.cmpi slt, %1, %c0_i32_46 : i32
        %61 = arith.extui %60 : i1 to i32
        %c0_i32_47 = arith.constant 0 : i32
        %62 = arith.cmpi ne, %61, %c0_i32_47 : i32
        scf.if %62 {
          %66 = arith.index_cast %59 : i32 to index
          %c128_50 = arith.constant 128 : index
          %67 = vector.load %arg4[%66, %c128_50] : memref<20x384xf32, #tpu.memory_space<vmem>>, vector<8x150xf32>
          %68 = vector.broadcast %44 : vector<1x150xf32> to vector<8x150xf32>
          %69 = arith.subf %68, %67 : vector<8x150xf32>
          %70 = vector.extract_strided_slice %67 {offsets = [0, 0], sizes = [8, 128], strides = [1, 1]} : vector<8x150xf32> to vector<8x128xf32>
          %71 = vector.extract_strided_slice %67 {offsets = [0, 1], sizes = [8, 128], strides = [1, 1]} : vector<8x150xf32> to vector<8x128xf32>
          %72 = arith.addf %70, %71 : vector<8x128xf32>
          %cst_51 = arith.constant 5.000000e-01 : f32
          %73 = vector.broadcast %cst_51 : f32 to vector<8x128xf32>
          %74 = arith.mulf %72, %73 : vector<8x128xf32>
          %75 = vector.broadcast %48 : vector<1x128xf32> to vector<8x128xf32>
          %76 = arith.subf %74, %75 : vector<8x128xf32>
          %cst_52 = arith.constant 3.000000e+00 : f32
          %77 = vector.broadcast %cst_52 : f32 to vector<8x128xf32>
          %78 = arith.subf %76, %77 : vector<8x128xf32>
          %79 = vector.extract_strided_slice %69 {offsets = [0, 2], sizes = [8, 128], strides = [1, 1]} : vector<8x150xf32> to vector<8x128xf32>
          %80 = arith.addf %78, %79 : vector<8x128xf32>
          %81 = math.absf %80 : vector<8x128xf32>
          %82 = vector.extract_strided_slice %69 {offsets = [0, 3], sizes = [8, 128], strides = [1, 1]} : vector<8x150xf32> to vector<8x128xf32>
          %83 = arith.addf %78, %82 : vector<8x128xf32>
          %84 = math.absf %83 : vector<8x128xf32>
          %85 = arith.minimumf %81, %84 : vector<8x128xf32>
          %86 = vector.extract_strided_slice %69 {offsets = [0, 4], sizes = [8, 128], strides = [1, 1]} : vector<8x150xf32> to vector<8x128xf32>
          %87 = arith.addf %78, %86 : vector<8x128xf32>
          %88 = math.absf %87 : vector<8x128xf32>
          %89 = arith.minimumf %85, %88 : vector<8x128xf32>
          %90 = vector.extract_strided_slice %69 {offsets = [0, 5], sizes = [8, 128], strides = [1, 1]} : vector<8x150xf32> to vector<8x128xf32>
          %91 = arith.addf %78, %90 : vector<8x128xf32>
          %92 = math.absf %91 : vector<8x128xf32>
          %93 = arith.minimumf %89, %92 : vector<8x128xf32>
          %94 = vector.extract_strided_slice %69 {offsets = [0, 6], sizes = [8, 128], strides = [1, 1]} : vector<8x150xf32> to vector<8x128xf32>
          %95 = arith.addf %78, %94 : vector<8x128xf32>
          %96 = math.absf %95 : vector<8x128xf32>
          %97 = arith.minimumf %93, %96 : vector<8x128xf32>
          %98 = vector.extract_strided_slice %69 {offsets = [0, 7], sizes = [8, 128], strides = [1, 1]} : vector<8x150xf32> to vector<8x128xf32>
          %99 = arith.addf %78, %98 : vector<8x128xf32>
          %100 = math.absf %99 : vector<8x128xf32>
          %101 = arith.minimumf %97, %100 : vector<8x128xf32>
          %102 = vector.extract_strided_slice %69 {offsets = [0, 8], sizes = [8, 128], strides = [1, 1]} : vector<8x150xf32> to vector<8x128xf32>
          %103 = arith.addf %78, %102 : vector<8x128xf32>
          %104 = math.absf %103 : vector<8x128xf32>
          %105 = arith.minimumf %101, %104 : vector<8x128xf32>
          %106 = vector.extract_strided_slice %69 {offsets = [0, 9], sizes = [8, 128], strides = [1, 1]} : vector<8x150xf32> to vector<8x128xf32>
          %107 = arith.addf %78, %106 : vector<8x128xf32>
          %108 = math.absf %107 : vector<8x128xf32>
          %109 = arith.minimumf %105, %108 : vector<8x128xf32>
          %110 = vector.extract_strided_slice %69 {offsets = [0, 10], sizes = [8, 128], strides = [1, 1]} : vector<8x150xf32> to vector<8x128xf32>
          %111 = arith.addf %78, %110 : vector<8x128xf32>
          %112 = math.absf %111 : vector<8x128xf32>
          %113 = arith.minimumf %109, %112 : vector<8x128xf32>
          %114 = vector.extract_strided_slice %69 {offsets = [0, 11], sizes = [8, 128], strides = [1, 1]} : vector<8x150xf32> to vector<8x128xf32>
          %115 = arith.addf %78, %114 : vector<8x128xf32>
          %116 = math.absf %115 : vector<8x128xf32>
          %117 = arith.minimumf %113, %116 : vector<8x128xf32>
          %118 = vector.extract_strided_slice %69 {offsets = [0, 12], sizes = [8, 128], strides = [1, 1]} : vector<8x150xf32> to vector<8x128xf32>
          %119 = arith.addf %78, %118 : vector<8x128xf32>
          %120 = math.absf %119 : vector<8x128xf32>
          %121 = arith.minimumf %117, %120 : vector<8x128xf32>
          %122 = vector.extract_strided_slice %69 {offsets = [0, 13], sizes = [8, 128], strides = [1, 1]} : vector<8x150xf32> to vector<8x128xf32>
          %123 = arith.addf %78, %122 : vector<8x128xf32>
          %124 = math.absf %123 : vector<8x128xf32>
          %125 = arith.minimumf %121, %124 : vector<8x128xf32>
          %126 = vector.extract_strided_slice %69 {offsets = [0, 14], sizes = [8, 128], strides = [1, 1]} : vector<8x150xf32> to vector<8x128xf32>
          %127 = arith.addf %78, %126 : vector<8x128xf32>
          %128 = math.absf %127 : vector<8x128xf32>
          %129 = arith.minimumf %125, %128 : vector<8x128xf32>
          %130 = vector.extract_strided_slice %69 {offsets = [0, 15], sizes = [8, 128], strides = [1, 1]} : vector<8x150xf32> to vector<8x128xf32>
          %131 = arith.addf %78, %130 : vector<8x128xf32>
          %132 = math.absf %131 : vector<8x128xf32>
          %133 = arith.minimumf %129, %132 : vector<8x128xf32>
          %134 = vector.extract_strided_slice %69 {offsets = [0, 16], sizes = [8, 128], strides = [1, 1]} : vector<8x150xf32> to vector<8x128xf32>
          %135 = arith.addf %78, %134 : vector<8x128xf32>
          %136 = math.absf %135 : vector<8x128xf32>
          %137 = arith.minimumf %133, %136 : vector<8x128xf32>
          %138 = vector.extract_strided_slice %69 {offsets = [0, 17], sizes = [8, 128], strides = [1, 1]} : vector<8x150xf32> to vector<8x128xf32>
          %139 = arith.addf %78, %138 : vector<8x128xf32>
          %140 = math.absf %139 : vector<8x128xf32>
          %141 = arith.minimumf %137, %140 : vector<8x128xf32>
          %142 = vector.extract_strided_slice %69 {offsets = [0, 18], sizes = [8, 128], strides = [1, 1]} : vector<8x150xf32> to vector<8x128xf32>
          %143 = arith.addf %78, %142 : vector<8x128xf32>
          %144 = math.absf %143 : vector<8x128xf32>
          %145 = arith.minimumf %141, %144 : vector<8x128xf32>
          %146 = vector.extract_strided_slice %69 {offsets = [0, 19], sizes = [8, 128], strides = [1, 1]} : vector<8x150xf32> to vector<8x128xf32>
          %147 = arith.addf %78, %146 : vector<8x128xf32>
          %148 = math.absf %147 : vector<8x128xf32>
          %149 = arith.minimumf %145, %148 : vector<8x128xf32>
          %150 = vector.extract_strided_slice %69 {offsets = [0, 20], sizes = [8, 128], strides = [1, 1]} : vector<8x150xf32> to vector<8x128xf32>
          %151 = arith.addf %78, %150 : vector<8x128xf32>
          %152 = math.absf %151 : vector<8x128xf32>
          %153 = arith.minimumf %149, %152 : vector<8x128xf32>
          %154 = vector.extract_strided_slice %69 {offsets = [0, 21], sizes = [8, 128], strides = [1, 1]} : vector<8x150xf32> to vector<8x128xf32>
          %155 = arith.addf %78, %154 : vector<8x128xf32>
          %156 = math.absf %155 : vector<8x128xf32>
          %157 = arith.minimumf %153, %156 : vector<8x128xf32>
          %158 = vector.extract_strided_slice %69 {offsets = [0, 22], sizes = [8, 128], strides = [1, 1]} : vector<8x150xf32> to vector<8x128xf32>
          %159 = arith.addf %78, %158 : vector<8x128xf32>
          %160 = math.absf %159 : vector<8x128xf32>
          %161 = arith.minimumf %157, %160 : vector<8x128xf32>
          %cst_53 = arith.constant 0.333333343 : f32
          %162 = vector.broadcast %cst_53 : f32 to vector<8x128xf32>
          %163 = arith.mulf %161, %162 : vector<8x128xf32>
          %cst_54 = arith.constant 1.000000e+00 : f32
          %164 = vector.broadcast %cst_54 : f32 to vector<8x128xf32>
          %165 = arith.minimumf %163, %164 : vector<8x128xf32>
          %c0_55 = arith.constant 0 : index
          %c0_56 = arith.constant 0 : index
          %166 = arith.index_cast %59 : i32 to index
          %c0_57 = arith.constant 0 : index
          %167 = vector.load %arg3[%c0_55, %c0_56, %166, %c0_57] : memref<1x1x20x128xf32, #tpu.memory_space<vmem>>, vector<1x1x8x128xf32>
          %168 = vector.shape_cast %167 : vector<1x1x8x128xf32> to vector<8x128xf32>
          %169 = vector.shape_cast %165 : vector<8x128xf32> to vector<1x1x8x128xf32>
          tpu.vector_store %arg3[%c0_55, %c0_56, %166, %c0_57], %169 {strides = array<i32>} : memref<1x1x20x128xf32, #tpu.memory_space<vmem>>, vector<1x1x8x128xf32>,
        } else {
        }
        %c0_i32_48 = arith.constant 0 : i32
        %63 = arith.cmpi sgt, %1, %c0_i32_48 : i32
        %64 = arith.extui %63 : i1 to i32
        %c0_i32_49 = arith.constant 0 : i32
        %65 = arith.cmpi ne, %64, %c0_i32_49 : i32
        scf.if %65 {
          %66 = arith.index_cast %59 : i32 to index
          %c106_50 = arith.constant 106 : index
          %67 = vector.load %arg4[%66, %c106_50] : memref<20x384xf32, #tpu.memory_space<vmem>>, vector<8x150xf32>
          %68 = vector.broadcast %50 : vector<1x150xf32> to vector<8x150xf32>
          %69 = arith.subf %68, %67 : vector<8x150xf32>
          %70 = vector.extract_strided_slice %67 {offsets = [0, 22], sizes = [8, 128], strides = [1, 1]} : vector<8x150xf32> to vector<8x128xf32>
          %71 = vector.extract_strided_slice %67 {offsets = [0, 21], sizes = [8, 128], strides = [1, 1]} : vector<8x150xf32> to vector<8x128xf32>
          %72 = arith.addf %70, %71 : vector<8x128xf32>
          %cst_51 = arith.constant 5.000000e-01 : f32
          %73 = vector.broadcast %cst_51 : f32 to vector<8x128xf32>
          %74 = arith.mulf %72, %73 : vector<8x128xf32>
          %75 = vector.broadcast %48 : vector<1x128xf32> to vector<8x128xf32>
          %76 = arith.addf %74, %75 : vector<8x128xf32>
          %cst_52 = arith.constant 3.000000e+00 : f32
          %77 = vector.broadcast %cst_52 : f32 to vector<8x128xf32>
          %78 = arith.subf %76, %77 : vector<8x128xf32>
          %79 = vector.extract_strided_slice %69 {offsets = [0, 20], sizes = [8, 128], strides = [1, 1]} : vector<8x150xf32> to vector<8x128xf32>
          %80 = arith.addf %78, %79 : vector<8x128xf32>
          %81 = math.absf %80 : vector<8x128xf32>
          %82 = vector.extract_strided_slice %69 {offsets = [0, 19], sizes = [8, 128], strides = [1, 1]} : vector<8x150xf32> to vector<8x128xf32>
          %83 = arith.addf %78, %82 : vector<8x128xf32>
          %84 = math.absf %83 : vector<8x128xf32>
          %85 = arith.minimumf %81, %84 : vector<8x128xf32>
          %86 = vector.extract_strided_slice %69 {offsets = [0, 18], sizes = [8, 128], strides = [1, 1]} : vector<8x150xf32> to vector<8x128xf32>
          %87 = arith.addf %78, %86 : vector<8x128xf32>
          %88 = math.absf %87 : vector<8x128xf32>
          %89 = arith.minimumf %85, %88 : vector<8x128xf32>
          %90 = vector.extract_strided_slice %69 {offsets = [0, 17], sizes = [8, 128], strides = [1, 1]} : vector<8x150xf32> to vector<8x128xf32>
          %91 = arith.addf %78, %90 : vector<8x128xf32>
          %92 = math.absf %91 : vector<8x128xf32>
          %93 = arith.minimumf %89, %92 : vector<8x128xf32>
          %94 = vector.extract_strided_slice %69 {offsets = [0, 16], sizes = [8, 128], strides = [1, 1]} : vector<8x150xf32> to vector<8x128xf32>
          %95 = arith.addf %78, %94 : vector<8x128xf32>
          %96 = math.absf %95 : vector<8x128xf32>
          %97 = arith.minimumf %93, %96 : vector<8x128xf32>
          %98 = vector.extract_strided_slice %69 {offsets = [0, 15], sizes = [8, 128], strides = [1, 1]} : vector<8x150xf32> to vector<8x128xf32>
          %99 = arith.addf %78, %98 : vector<8x128xf32>
          %100 = math.absf %99 : vector<8x128xf32>
          %101 = arith.minimumf %97, %100 : vector<8x128xf32>
          %102 = vector.extract_strided_slice %69 {offsets = [0, 14], sizes = [8, 128], strides = [1, 1]} : vector<8x150xf32> to vector<8x128xf32>
          %103 = arith.addf %78, %102 : vector<8x128xf32>
          %104 = math.absf %103 : vector<8x128xf32>
          %105 = arith.minimumf %101, %104 : vector<8x128xf32>
          %106 = vector.extract_strided_slice %69 {offsets = [0, 13], sizes = [8, 128], strides = [1, 1]} : vector<8x150xf32> to vector<8x128xf32>
          %107 = arith.addf %78, %106 : vector<8x128xf32>
          %108 = math.absf %107 : vector<8x128xf32>
          %109 = arith.minimumf %105, %108 : vector<8x128xf32>
          %110 = vector.extract_strided_slice %69 {offsets = [0, 12], sizes = [8, 128], strides = [1, 1]} : vector<8x150xf32> to vector<8x128xf32>
          %111 = arith.addf %78, %110 : vector<8x128xf32>
          %112 = math.absf %111 : vector<8x128xf32>
          %113 = arith.minimumf %109, %112 : vector<8x128xf32>
          %114 = vector.extract_strided_slice %69 {offsets = [0, 11], sizes = [8, 128], strides = [1, 1]} : vector<8x150xf32> to vector<8x128xf32>
          %115 = arith.addf %78, %114 : vector<8x128xf32>
          %116 = math.absf %115 : vector<8x128xf32>
          %117 = arith.minimumf %113, %116 : vector<8x128xf32>
          %118 = vector.extract_strided_slice %69 {offsets = [0, 10], sizes = [8, 128], strides = [1, 1]} : vector<8x150xf32> to vector<8x128xf32>
          %119 = arith.addf %78, %118 : vector<8x128xf32>
          %120 = math.absf %119 : vector<8x128xf32>
          %121 = arith.minimumf %117, %120 : vector<8x128xf32>
          %122 = vector.extract_strided_slice %69 {offsets = [0, 9], sizes = [8, 128], strides = [1, 1]} : vector<8x150xf32> to vector<8x128xf32>
          %123 = arith.addf %78, %122 : vector<8x128xf32>
          %124 = math.absf %123 : vector<8x128xf32>
          %125 = arith.minimumf %121, %124 : vector<8x128xf32>
          %126 = vector.extract_strided_slice %69 {offsets = [0, 8], sizes = [8, 128], strides = [1, 1]} : vector<8x150xf32> to vector<8x128xf32>
          %127 = arith.addf %78, %126 : vector<8x128xf32>
          %128 = math.absf %127 : vector<8x128xf32>
          %129 = arith.minimumf %125, %128 : vector<8x128xf32>
          %130 = vector.extract_strided_slice %69 {offsets = [0, 7], sizes = [8, 128], strides = [1, 1]} : vector<8x150xf32> to vector<8x128xf32>
          %131 = arith.addf %78, %130 : vector<8x128xf32>
          %132 = math.absf %131 : vector<8x128xf32>
          %133 = arith.minimumf %129, %132 : vector<8x128xf32>
          %134 = vector.extract_strided_slice %69 {offsets = [0, 6], sizes = [8, 128], strides = [1, 1]} : vector<8x150xf32> to vector<8x128xf32>
          %135 = arith.addf %78, %134 : vector<8x128xf32>
          %136 = math.absf %135 : vector<8x128xf32>
          %137 = arith.minimumf %133, %136 : vector<8x128xf32>
          %138 = vector.extract_strided_slice %69 {offsets = [0, 5], sizes = [8, 128], strides = [1, 1]} : vector<8x150xf32> to vector<8x128xf32>
          %139 = arith.addf %78, %138 : vector<8x128xf32>
          %140 = math.absf %139 : vector<8x128xf32>
          %141 = arith.minimumf %137, %140 : vector<8x128xf32>
          %142 = vector.extract_strided_slice %69 {offsets = [0, 4], sizes = [8, 128], strides = [1, 1]} : vector<8x150xf32> to vector<8x128xf32>
          %143 = arith.addf %78, %142 : vector<8x128xf32>
          %144 = math.absf %143 : vector<8x128xf32>
          %145 = arith.minimumf %141, %144 : vector<8x128xf32>
          %146 = vector.extract_strided_slice %69 {offsets = [0, 3], sizes = [8, 128], strides = [1, 1]} : vector<8x150xf32> to vector<8x128xf32>
          %147 = arith.addf %78, %146 : vector<8x128xf32>
          %148 = math.absf %147 : vector<8x128xf32>
          %149 = arith.minimumf %145, %148 : vector<8x128xf32>
          %150 = vector.extract_strided_slice %69 {offsets = [0, 2], sizes = [8, 128], strides = [1, 1]} : vector<8x150xf32> to vector<8x128xf32>
          %151 = arith.addf %78, %150 : vector<8x128xf32>
          %152 = math.absf %151 : vector<8x128xf32>
          %153 = arith.minimumf %149, %152 : vector<8x128xf32>
          %154 = vector.extract_strided_slice %69 {offsets = [0, 1], sizes = [8, 128], strides = [1, 1]} : vector<8x150xf32> to vector<8x128xf32>
          %155 = arith.addf %78, %154 : vector<8x128xf32>
          %156 = math.absf %155 : vector<8x128xf32>
          %157 = arith.minimumf %153, %156 : vector<8x128xf32>
          %158 = vector.extract_strided_slice %69 {offsets = [0, 0], sizes = [8, 128], strides = [1, 1]} : vector<8x150xf32> to vector<8x128xf32>
          %159 = arith.addf %78, %158 : vector<8x128xf32>
          %160 = math.absf %159 : vector<8x128xf32>
          %161 = arith.minimumf %157, %160 : vector<8x128xf32>
          %cst_53 = arith.constant 0.333333343 : f32
          %162 = vector.broadcast %cst_53 : f32 to vector<8x128xf32>
          %163 = arith.mulf %161, %162 : vector<8x128xf32>
          %cst_54 = arith.constant 1.000000e+00 : f32
          %164 = vector.broadcast %cst_54 : f32 to vector<8x128xf32>
          %165 = arith.minimumf %163, %164 : vector<8x128xf32>
          %c0_55 = arith.constant 0 : index
          %c0_56 = arith.constant 0 : index
          %166 = arith.index_cast %59 : i32 to index
          %c0_57 = arith.constant 0 : index
          %167 = vector.load %arg3[%c0_55, %c0_56, %166, %c0_57] : memref<1x1x20x128xf32, #tpu.memory_space<vmem>>, vector<1x1x8x128xf32>
          %168 = vector.shape_cast %167 : vector<1x1x8x128xf32> to vector<8x128xf32>
          %169 = vector.shape_cast %165 : vector<8x128xf32> to vector<1x1x8x128xf32>
          tpu.vector_store %arg3[%c0_55, %c0_56, %166, %c0_57], %169 {strides = array<i32>} : memref<1x1x20x128xf32, #tpu.memory_space<vmem>>, vector<1x1x8x128xf32>,
        } else {
        }
      }
      %c2_i32_41 = arith.constant 2 : i32
      %c0_i32_42 = arith.constant 0 : i32
      %52 = arith.cmpi slt, %1, %c0_i32_42 : i32
      %53 = arith.extui %52 : i1 to i32
      %c0_i32_43 = arith.constant 0 : i32
      %54 = arith.cmpi ne, %53, %c0_i32_43 : i32
      scf.if %54 {
        %c16 = arith.constant 16 : index
        %c128_46 = arith.constant 128 : index
        %58 = vector.load %arg4[%c16, %c128_46] : memref<20x384xf32, #tpu.memory_space<vmem>>, vector<4x150xf32>
        %59 = vector.broadcast %44 : vector<1x150xf32> to vector<4x150xf32>
        %60 = arith.subf %59, %58 : vector<4x150xf32>
        %61 = vector.extract_strided_slice %58 {offsets = [0, 0], sizes = [4, 128], strides = [1, 1]} : vector<4x150xf32> to vector<4x128xf32>
        %62 = vector.extract_strided_slice %58 {offsets = [0, 1], sizes = [4, 128], strides = [1, 1]} : vector<4x150xf32> to vector<4x128xf32>
        %63 = arith.addf %61, %62 : vector<4x128xf32>
        %cst_47 = arith.constant 5.000000e-01 : f32
        %64 = vector.broadcast %cst_47 : f32 to vector<4x128xf32>
        %65 = arith.mulf %63, %64 : vector<4x128xf32>
        %66 = vector.broadcast %48 : vector<1x128xf32> to vector<4x128xf32>
        %67 = arith.subf %65, %66 : vector<4x128xf32>
        %cst_48 = arith.constant 3.000000e+00 : f32
        %68 = vector.broadcast %cst_48 : f32 to vector<4x128xf32>
        %69 = arith.subf %67, %68 : vector<4x128xf32>
        %70 = vector.extract_strided_slice %60 {offsets = [0, 2], sizes = [4, 128], strides = [1, 1]} : vector<4x150xf32> to vector<4x128xf32>
        %71 = arith.addf %69, %70 : vector<4x128xf32>
        %72 = math.absf %71 : vector<4x128xf32>
        %73 = vector.extract_strided_slice %60 {offsets = [0, 3], sizes = [4, 128], strides = [1, 1]} : vector<4x150xf32> to vector<4x128xf32>
        %74 = arith.addf %69, %73 : vector<4x128xf32>
        %75 = math.absf %74 : vector<4x128xf32>
        %76 = arith.minimumf %72, %75 : vector<4x128xf32>
        %77 = vector.extract_strided_slice %60 {offsets = [0, 4], sizes = [4, 128], strides = [1, 1]} : vector<4x150xf32> to vector<4x128xf32>
        %78 = arith.addf %69, %77 : vector<4x128xf32>
        %79 = math.absf %78 : vector<4x128xf32>
        %80 = arith.minimumf %76, %79 : vector<4x128xf32>
        %81 = vector.extract_strided_slice %60 {offsets = [0, 5], sizes = [4, 128], strides = [1, 1]} : vector<4x150xf32> to vector<4x128xf32>
        %82 = arith.addf %69, %81 : vector<4x128xf32>
        %83 = math.absf %82 : vector<4x128xf32>
        %84 = arith.minimumf %80, %83 : vector<4x128xf32>
        %85 = vector.extract_strided_slice %60 {offsets = [0, 6], sizes = [4, 128], strides = [1, 1]} : vector<4x150xf32> to vector<4x128xf32>
        %86 = arith.addf %69, %85 : vector<4x128xf32>
        %87 = math.absf %86 : vector<4x128xf32>
        %88 = arith.minimumf %84, %87 : vector<4x128xf32>
        %89 = vector.extract_strided_slice %60 {offsets = [0, 7], sizes = [4, 128], strides = [1, 1]} : vector<4x150xf32> to vector<4x128xf32>
        %90 = arith.addf %69, %89 : vector<4x128xf32>
        %91 = math.absf %90 : vector<4x128xf32>
        %92 = arith.minimumf %88, %91 : vector<4x128xf32>
        %93 = vector.extract_strided_slice %60 {offsets = [0, 8], sizes = [4, 128], strides = [1, 1]} : vector<4x150xf32> to vector<4x128xf32>
        %94 = arith.addf %69, %93 : vector<4x128xf32>
        %95 = math.absf %94 : vector<4x128xf32>
        %96 = arith.minimumf %92, %95 : vector<4x128xf32>
        %97 = vector.extract_strided_slice %60 {offsets = [0, 9], sizes = [4, 128], strides = [1, 1]} : vector<4x150xf32> to vector<4x128xf32>
        %98 = arith.addf %69, %97 : vector<4x128xf32>
        %99 = math.absf %98 : vector<4x128xf32>
        %100 = arith.minimumf %96, %99 : vector<4x128xf32>
        %101 = vector.extract_strided_slice %60 {offsets = [0, 10], sizes = [4, 128], strides = [1, 1]} : vector<4x150xf32> to vector<4x128xf32>
        %102 = arith.addf %69, %101 : vector<4x128xf32>
        %103 = math.absf %102 : vector<4x128xf32>
        %104 = arith.minimumf %100, %103 : vector<4x128xf32>
        %105 = vector.extract_strided_slice %60 {offsets = [0, 11], sizes = [4, 128], strides = [1, 1]} : vector<4x150xf32> to vector<4x128xf32>
        %106 = arith.addf %69, %105 : vector<4x128xf32>
        %107 = math.absf %106 : vector<4x128xf32>
        %108 = arith.minimumf %104, %107 : vector<4x128xf32>
        %109 = vector.extract_strided_slice %60 {offsets = [0, 12], sizes = [4, 128], strides = [1, 1]} : vector<4x150xf32> to vector<4x128xf32>
        %110 = arith.addf %69, %109 : vector<4x128xf32>
        %111 = math.absf %110 : vector<4x128xf32>
        %112 = arith.minimumf %108, %111 : vector<4x128xf32>
        %113 = vector.extract_strided_slice %60 {offsets = [0, 13], sizes = [4, 128], strides = [1, 1]} : vector<4x150xf32> to vector<4x128xf32>
        %114 = arith.addf %69, %113 : vector<4x128xf32>
        %115 = math.absf %114 : vector<4x128xf32>
        %116 = arith.minimumf %112, %115 : vector<4x128xf32>
        %117 = vector.extract_strided_slice %60 {offsets = [0, 14], sizes = [4, 128], strides = [1, 1]} : vector<4x150xf32> to vector<4x128xf32>
        %118 = arith.addf %69, %117 : vector<4x128xf32>
        %119 = math.absf %118 : vector<4x128xf32>
        %120 = arith.minimumf %116, %119 : vector<4x128xf32>
        %121 = vector.extract_strided_slice %60 {offsets = [0, 15], sizes = [4, 128], strides = [1, 1]} : vector<4x150xf32> to vector<4x128xf32>
        %122 = arith.addf %69, %121 : vector<4x128xf32>
        %123 = math.absf %122 : vector<4x128xf32>
        %124 = arith.minimumf %120, %123 : vector<4x128xf32>
        %125 = vector.extract_strided_slice %60 {offsets = [0, 16], sizes = [4, 128], strides = [1, 1]} : vector<4x150xf32> to vector<4x128xf32>
        %126 = arith.addf %69, %125 : vector<4x128xf32>
        %127 = math.absf %126 : vector<4x128xf32>
        %128 = arith.minimumf %124, %127 : vector<4x128xf32>
        %129 = vector.extract_strided_slice %60 {offsets = [0, 17], sizes = [4, 128], strides = [1, 1]} : vector<4x150xf32> to vector<4x128xf32>
        %130 = arith.addf %69, %129 : vector<4x128xf32>
        %131 = math.absf %130 : vector<4x128xf32>
        %132 = arith.minimumf %128, %131 : vector<4x128xf32>
        %133 = vector.extract_strided_slice %60 {offsets = [0, 18], sizes = [4, 128], strides = [1, 1]} : vector<4x150xf32> to vector<4x128xf32>
        %134 = arith.addf %69, %133 : vector<4x128xf32>
        %135 = math.absf %134 : vector<4x128xf32>
        %136 = arith.minimumf %132, %135 : vector<4x128xf32>
        %137 = vector.extract_strided_slice %60 {offsets = [0, 19], sizes = [4, 128], strides = [1, 1]} : vector<4x150xf32> to vector<4x128xf32>
        %138 = arith.addf %69, %137 : vector<4x128xf32>
        %139 = math.absf %138 : vector<4x128xf32>
        %140 = arith.minimumf %136, %139 : vector<4x128xf32>
        %141 = vector.extract_strided_slice %60 {offsets = [0, 20], sizes = [4, 128], strides = [1, 1]} : vector<4x150xf32> to vector<4x128xf32>
        %142 = arith.addf %69, %141 : vector<4x128xf32>
        %143 = math.absf %142 : vector<4x128xf32>
        %144 = arith.minimumf %140, %143 : vector<4x128xf32>
        %145 = vector.extract_strided_slice %60 {offsets = [0, 21], sizes = [4, 128], strides = [1, 1]} : vector<4x150xf32> to vector<4x128xf32>
        %146 = arith.addf %69, %145 : vector<4x128xf32>
        %147 = math.absf %146 : vector<4x128xf32>
        %148 = arith.minimumf %144, %147 : vector<4x128xf32>
        %149 = vector.extract_strided_slice %60 {offsets = [0, 22], sizes = [4, 128], strides = [1, 1]} : vector<4x150xf32> to vector<4x128xf32>
        %150 = arith.addf %69, %149 : vector<4x128xf32>
        %151 = math.absf %150 : vector<4x128xf32>
        %152 = arith.minimumf %148, %151 : vector<4x128xf32>
        %cst_49 = arith.constant 0.333333343 : f32
        %153 = vector.broadcast %cst_49 : f32 to vector<4x128xf32>
        %154 = arith.mulf %152, %153 : vector<4x128xf32>
        %cst_50 = arith.constant 1.000000e+00 : f32
        %155 = vector.broadcast %cst_50 : f32 to vector<4x128xf32>
        %156 = arith.minimumf %154, %155 : vector<4x128xf32>
        %c0_51 = arith.constant 0 : index
        %c0_52 = arith.constant 0 : index
        %c16_53 = arith.constant 16 : index
        %c0_54 = arith.constant 0 : index
        %157 = vector.load %arg3[%c0_51, %c0_52, %c16_53, %c0_54] : memref<1x1x20x128xf32, #tpu.memory_space<vmem>>, vector<1x1x4x128xf32>
        %158 = vector.shape_cast %157 : vector<1x1x4x128xf32> to vector<4x128xf32>
        %159 = vector.shape_cast %156 : vector<4x128xf32> to vector<1x1x4x128xf32>
        tpu.vector_store %arg3[%c0_51, %c0_52, %c16_53, %c0_54], %159 {strides = array<i32>} : memref<1x1x20x128xf32, #tpu.memory_space<vmem>>, vector<1x1x4x128xf32>,
      } else {
      }
      %c0_i32_44 = arith.constant 0 : i32
      %55 = arith.cmpi sgt, %1, %c0_i32_44 : i32
      %56 = arith.extui %55 : i1 to i32
      %c0_i32_45 = arith.constant 0 : i32
      %57 = arith.cmpi ne, %56, %c0_i32_45 : i32
      scf.if %57 {
        %c16 = arith.constant 16 : index
        %c106_46 = arith.constant 106 : index
        %58 = vector.load %arg4[%c16, %c106_46] : memref<20x384xf32, #tpu.memory_space<vmem>>, vector<4x150xf32>
        %59 = vector.broadcast %50 : vector<1x150xf32> to vector<4x150xf32>
        %60 = arith.subf %59, %58 : vector<4x150xf32>
        %61 = vector.extract_strided_slice %58 {offsets = [0, 22], sizes = [4, 128], strides = [1, 1]} : vector<4x150xf32> to vector<4x128xf32>
        %62 = vector.extract_strided_slice %58 {offsets = [0, 21], sizes = [4, 128], strides = [1, 1]} : vector<4x150xf32> to vector<4x128xf32>
        %63 = arith.addf %61, %62 : vector<4x128xf32>
        %cst_47 = arith.constant 5.000000e-01 : f32
        %64 = vector.broadcast %cst_47 : f32 to vector<4x128xf32>
        %65 = arith.mulf %63, %64 : vector<4x128xf32>
        %66 = vector.broadcast %48 : vector<1x128xf32> to vector<4x128xf32>
        %67 = arith.addf %65, %66 : vector<4x128xf32>
        %cst_48 = arith.constant 3.000000e+00 : f32
        %68 = vector.broadcast %cst_48 : f32 to vector<4x128xf32>
        %69 = arith.subf %67, %68 : vector<4x128xf32>
        %70 = vector.extract_strided_slice %60 {offsets = [0, 20], sizes = [4, 128], strides = [1, 1]} : vector<4x150xf32> to vector<4x128xf32>
        %71 = arith.addf %69, %70 : vector<4x128xf32>
        %72 = math.absf %71 : vector<4x128xf32>
        %73 = vector.extract_strided_slice %60 {offsets = [0, 19], sizes = [4, 128], strides = [1, 1]} : vector<4x150xf32> to vector<4x128xf32>
        %74 = arith.addf %69, %73 : vector<4x128xf32>
        %75 = math.absf %74 : vector<4x128xf32>
        %76 = arith.minimumf %72, %75 : vector<4x128xf32>
        %77 = vector.extract_strided_slice %60 {offsets = [0, 18], sizes = [4, 128], strides = [1, 1]} : vector<4x150xf32> to vector<4x128xf32>
        %78 = arith.addf %69, %77 : vector<4x128xf32>
        %79 = math.absf %78 : vector<4x128xf32>
        %80 = arith.minimumf %76, %79 : vector<4x128xf32>
        %81 = vector.extract_strided_slice %60 {offsets = [0, 17], sizes = [4, 128], strides = [1, 1]} : vector<4x150xf32> to vector<4x128xf32>
        %82 = arith.addf %69, %81 : vector<4x128xf32>
        %83 = math.absf %82 : vector<4x128xf32>
        %84 = arith.minimumf %80, %83 : vector<4x128xf32>
        %85 = vector.extract_strided_slice %60 {offsets = [0, 16], sizes = [4, 128], strides = [1, 1]} : vector<4x150xf32> to vector<4x128xf32>
        %86 = arith.addf %69, %85 : vector<4x128xf32>
        %87 = math.absf %86 : vector<4x128xf32>
        %88 = arith.minimumf %84, %87 : vector<4x128xf32>
        %89 = vector.extract_strided_slice %60 {offsets = [0, 15], sizes = [4, 128], strides = [1, 1]} : vector<4x150xf32> to vector<4x128xf32>
        %90 = arith.addf %69, %89 : vector<4x128xf32>
        %91 = math.absf %90 : vector<4x128xf32>
        %92 = arith.minimumf %88, %91 : vector<4x128xf32>
        %93 = vector.extract_strided_slice %60 {offsets = [0, 14], sizes = [4, 128], strides = [1, 1]} : vector<4x150xf32> to vector<4x128xf32>
        %94 = arith.addf %69, %93 : vector<4x128xf32>
        %95 = math.absf %94 : vector<4x128xf32>
        %96 = arith.minimumf %92, %95 : vector<4x128xf32>
        %97 = vector.extract_strided_slice %60 {offsets = [0, 13], sizes = [4, 128], strides = [1, 1]} : vector<4x150xf32> to vector<4x128xf32>
        %98 = arith.addf %69, %97 : vector<4x128xf32>
        %99 = math.absf %98 : vector<4x128xf32>
        %100 = arith.minimumf %96, %99 : vector<4x128xf32>
        %101 = vector.extract_strided_slice %60 {offsets = [0, 12], sizes = [4, 128], strides = [1, 1]} : vector<4x150xf32> to vector<4x128xf32>
        %102 = arith.addf %69, %101 : vector<4x128xf32>
        %103 = math.absf %102 : vector<4x128xf32>
        %104 = arith.minimumf %100, %103 : vector<4x128xf32>
        %105 = vector.extract_strided_slice %60 {offsets = [0, 11], sizes = [4, 128], strides = [1, 1]} : vector<4x150xf32> to vector<4x128xf32>
        %106 = arith.addf %69, %105 : vector<4x128xf32>
        %107 = math.absf %106 : vector<4x128xf32>
        %108 = arith.minimumf %104, %107 : vector<4x128xf32>
        %109 = vector.extract_strided_slice %60 {offsets = [0, 10], sizes = [4, 128], strides = [1, 1]} : vector<4x150xf32> to vector<4x128xf32>
        %110 = arith.addf %69, %109 : vector<4x128xf32>
        %111 = math.absf %110 : vector<4x128xf32>
        %112 = arith.minimumf %108, %111 : vector<4x128xf32>
        %113 = vector.extract_strided_slice %60 {offsets = [0, 9], sizes = [4, 128], strides = [1, 1]} : vector<4x150xf32> to vector<4x128xf32>
        %114 = arith.addf %69, %113 : vector<4x128xf32>
        %115 = math.absf %114 : vector<4x128xf32>
        %116 = arith.minimumf %112, %115 : vector<4x128xf32>
        %117 = vector.extract_strided_slice %60 {offsets = [0, 8], sizes = [4, 128], strides = [1, 1]} : vector<4x150xf32> to vector<4x128xf32>
        %118 = arith.addf %69, %117 : vector<4x128xf32>
        %119 = math.absf %118 : vector<4x128xf32>
        %120 = arith.minimumf %116, %119 : vector<4x128xf32>
        %121 = vector.extract_strided_slice %60 {offsets = [0, 7], sizes = [4, 128], strides = [1, 1]} : vector<4x150xf32> to vector<4x128xf32>
        %122 = arith.addf %69, %121 : vector<4x128xf32>
        %123 = math.absf %122 : vector<4x128xf32>
        %124 = arith.minimumf %120, %123 : vector<4x128xf32>
        %125 = vector.extract_strided_slice %60 {offsets = [0, 6], sizes = [4, 128], strides = [1, 1]} : vector<4x150xf32> to vector<4x128xf32>
        %126 = arith.addf %69, %125 : vector<4x128xf32>
        %127 = math.absf %126 : vector<4x128xf32>
        %128 = arith.minimumf %124, %127 : vector<4x128xf32>
        %129 = vector.extract_strided_slice %60 {offsets = [0, 5], sizes = [4, 128], strides = [1, 1]} : vector<4x150xf32> to vector<4x128xf32>
        %130 = arith.addf %69, %129 : vector<4x128xf32>
        %131 = math.absf %130 : vector<4x128xf32>
        %132 = arith.minimumf %128, %131 : vector<4x128xf32>
        %133 = vector.extract_strided_slice %60 {offsets = [0, 4], sizes = [4, 128], strides = [1, 1]} : vector<4x150xf32> to vector<4x128xf32>
        %134 = arith.addf %69, %133 : vector<4x128xf32>
        %135 = math.absf %134 : vector<4x128xf32>
        %136 = arith.minimumf %132, %135 : vector<4x128xf32>
        %137 = vector.extract_strided_slice %60 {offsets = [0, 3], sizes = [4, 128], strides = [1, 1]} : vector<4x150xf32> to vector<4x128xf32>
        %138 = arith.addf %69, %137 : vector<4x128xf32>
        %139 = math.absf %138 : vector<4x128xf32>
        %140 = arith.minimumf %136, %139 : vector<4x128xf32>
        %141 = vector.extract_strided_slice %60 {offsets = [0, 2], sizes = [4, 128], strides = [1, 1]} : vector<4x150xf32> to vector<4x128xf32>
        %142 = arith.addf %69, %141 : vector<4x128xf32>
        %143 = math.absf %142 : vector<4x128xf32>
        %144 = arith.minimumf %140, %143 : vector<4x128xf32>
        %145 = vector.extract_strided_slice %60 {offsets = [0, 1], sizes = [4, 128], strides = [1, 1]} : vector<4x150xf32> to vector<4x128xf32>
        %146 = arith.addf %69, %145 : vector<4x128xf32>
        %147 = math.absf %146 : vector<4x128xf32>
        %148 = arith.minimumf %144, %147 : vector<4x128xf32>
        %149 = vector.extract_strided_slice %60 {offsets = [0, 0], sizes = [4, 128], strides = [1, 1]} : vector<4x150xf32> to vector<4x128xf32>
        %150 = arith.addf %69, %149 : vector<4x128xf32>
        %151 = math.absf %150 : vector<4x128xf32>
        %152 = arith.minimumf %148, %151 : vector<4x128xf32>
        %cst_49 = arith.constant 0.333333343 : f32
        %153 = vector.broadcast %cst_49 : f32 to vector<4x128xf32>
        %154 = arith.mulf %152, %153 : vector<4x128xf32>
        %cst_50 = arith.constant 1.000000e+00 : f32
        %155 = vector.broadcast %cst_50 : f32 to vector<4x128xf32>
        %156 = arith.minimumf %154, %155 : vector<4x128xf32>
        %c0_51 = arith.constant 0 : index
        %c0_52 = arith.constant 0 : index
        %c16_53 = arith.constant 16 : index
        %c0_54 = arith.constant 0 : index
        %157 = vector.load %arg3[%c0_51, %c0_52, %c16_53, %c0_54] : memref<1x1x20x128xf32, #tpu.memory_space<vmem>>, vector<1x1x4x128xf32>
        %158 = vector.shape_cast %157 : vector<1x1x4x128xf32> to vector<4x128xf32>
        %159 = vector.shape_cast %156 : vector<4x128xf32> to vector<1x1x4x128xf32>
        tpu.vector_store %arg3[%c0_51, %c0_52, %c16_53, %c0_54], %159 {strides = array<i32>} : memref<1x1x20x128xf32, #tpu.memory_space<vmem>>, vector<1x1x4x128xf32>,
      } else {
      }
    } else {
    }
    return
  }
  func.func @transform_0(%arg0: i32, %arg1: memref<3xi32, #tpu.memory_space<smem>>) -> (i32, i32, i32, i32) {
    %c0_i32 = arith.constant 0 : i32
    %c0_i32_0 = arith.constant 0 : i32
    %c0_i32_1 = arith.constant 0 : i32
    %c0_i32_2 = arith.constant 0 : i32
    return %arg0, %c0_i32, %c0_i32_0, %c0_i32_1 : i32, i32, i32, i32
  }
  func.func @transform_1(%arg0: i32, %arg1: memref<3xi32, #tpu.memory_space<smem>>) -> (i32, i32, i32, i32) {
    %c0_i32 = arith.constant 0 : i32
    %c0_i32_0 = arith.constant 0 : i32
    %c0_i32_1 = arith.constant 0 : i32
    %c0_i32_2 = arith.constant 0 : i32
    return %arg0, %c0_i32, %c0_i32_0, %c0_i32_1 : i32, i32, i32, i32
  }
}

</mosaic_0001>

<bundles_post_ra>
// kernel: tpu_custom_call.1
= control target key start
LH: loop header
LB: loop body
LE: loop exit
PB: predicated region body
PF: predicated region fallthrough
CT: control target
= control target key end

     0   :  { %s1830_s0 = inlined_call_operand.vmem [shape: s32[3], index: 0, kind: input, shape index: {}]   ;;  %s1831_s1 = inlined_call_operand.vmem [shape: f32[3,1,20,128], index: 1, kind: input, shape index: {}]   ;;  %s1832_s2 = inlined_call_operand.vmem [shape: f32[3,1,20,128], index: 2, kind: output, shape index: {}]  }
   0x1   :  { %s7_s11 = sshll.u32 %s1830_s0, 4  ;;  %s8_s11 = int_to_ptr.vmem [resolvable:$true] %s7_s11 }
   0x2   :  { %s1390_s12 = scalar_lea.vmem %s8_s11, 16  ;;  %p1395_p1 = scmp.lt.s32.totalorder %s8_s11, %s8_s11 }
   0x3   :  { %p1391_p0 = scmp.ne.s32.totalorder %s8_s11, %s1390_s12  ;;  %p1396_p2 = scmp.lt.s32.totalorder %s1390_s12, %s1390_s12 }
   0x5   :  { %p1397_p3 = por %p1396_p2, %p1395_p1 }
   0x7   :  { %p1398_p4 = pnand %p1397_p3, %p1391_p0 }
   0x9   :  { %1401 = shalt.err (!%p1398_p4)  }
   0xa   :  { %s1420_s13 = smov [#allocation4]  }
   0xb   :  { %10 = dma.vmem_to_smem %s8_s11, 16, %s1420_s13, [#allocation3] }
   0xc   :  { %1410 = dma.done.wait [#allocation3], 16 }
   0xd   :  { %1411 = vsyncadd [#allocation3], 4294967280 }
   0xe   :  { %12 = sfence }
   0xf   :  { %s1530_s14 = smov 0  }
  0x10 LB: > { %s1252_s0 = sadd.s32 4294967295, %s1414_s14   ;;  %p1256_p5 = scmp.ge.s32.totalorder %s1414_s14, 1  ;;  %s1414_s14 = sphi %s1530_s14, %s18_s14  }
  0x11   : > { %p94_p6 = scmp.lt.s32.totalorder %s1414_s14, 4 }
  0x13   : > { %p95_p7 = pnand %p1256_p5, %p94_p6 }
  0x14   : > { %p114_p8 = scmp.lt.s32.totalorder (!%p95_p7), %s1252_s0, 2  ;;  %s1538_s15 = sld [smem:[#allocation4 + %s1252_s0]] (!%p95_p7) }
  0x15   : > { %98 = sbr.rel (%p95_p7) target bundleno = 1298 (0x512), region = 24 }
  0x1a   : > { %p1259_p9 = scmp.ne.s32.totalorder (!%p95_p7), %s1538_s15, 0 }
  0x1c   : > { %s1834_s0 = smov (!%p114_p8, %s1252_s0), 2  ;;  %128 = sbr.rel (%p1259_p9) target bundleno = 35 (0x23), region = 28 }
  0x1d   : > { %s1276_s16 = smul.u32 24, %s1834_s0  ;;  %v1421_v0 = vmov (!%p1259_p9), 0.0  }
  0x1f   : > { %s1543_s19 = scalar_lea.vmem %s1831_s1, %s1276_s16  ;;  %s1548_s22 = scalar_lea.vmem %s1832_s2, %s1276_s16 }
  0x20   : > { %129 = vst [vmem:[%s1548_s22] sm:$0xff] (!%p1259_p9), %v1421_v0  ;;  %130 = vst [vmem:[%s1548_s22 + $0x8] sm:$0xff] (!%p1259_p9), %v1421_v0 }
  0x21   : > { %131 = vst [vmem:[%s1548_s22 + $0x10] sm:$0xf] (!%p1259_p9), %v1421_v0 }
  0x23 PF: > { %p1260_p10 = scmp.eq.s32.totalorder %s1538_s15, 0 }
  0x24   : > { %v136_v1 = vld [vmem:[%s1543_s19] sm:$0xff] (!%p1260_p10)  ;;  %v1422_v4 = vmov (!%p1260_p10), 127   ;;  %v1423_v5 = vmov (!%p1260_p10), 0   ;;  %v137_v9 = vld [vmem:[%s1543_s19 + $0x8] sm:$0xff] (!%p1260_p10)  ;;  %v138_v13 = vld [vmem:[%s1543_s19 + $0x10] sm:$0x3] (!%p1260_p10)  ;;  %v216_v32 = vlaneseq (!%p1260_p10) }
  0x25   : > { %135 = sbr.rel (%p1260_p10) target bundleno = 1298 (0x512), region = 32  ;;  %v139_v2 = vld [vmem:[%s1543_s19 + $0x1] sm:$0xff] (!%p1260_p10)  ;;  %1386 = vset.pattern.permute.xlu1 (!%p1260_p10), %v1422_v4  ;;  %1385 = vset.pattern.permute.xlu0 (!%p1260_p10), %v1423_v5  ;;  %v166_v7 = vld [vmem:[%s1543_s19] sm:$0x1] (!%p1260_p10)  ;;  %v140_v11 = vld [vmem:[%s1543_s19 + $0x9] sm:$0xff] (!%p1260_p10)  ;;  %vm154_vm0 = vcmask (!%p1260_p10), 1040384  }
  0x26   : > { %v145_v3 = vld [vmem:[%s1543_s19 + $0x2] sm:$0xff] (!%p1260_p10)  ;;  %v142_v6 = vadd.f32 (!%p1260_p10), %v139_v2, %v136_v1  ;;  %v168_v8 = vld [vmem:[%s1543_s19 + $0x1] sm:$0x1] (!%p1260_p10)  ;;  %v167_v10 = vmul.f32 (!%p1260_p10), 2.0, %v166_v7  ;;  %v146_v12 = vld [vmem:[%s1543_s19 + $0xa] sm:$0xff] (!%p1260_p10)  ;;  %v143_v15 = vadd.f32 (!%p1260_p10), %v140_v11, %v137_v9  ;;  %v217_v33 = vand.u32 (!%p1260_p10), 127, %v216_v32 }
  0x27   : > { %v141_v16 = vld [vmem:[%s1543_s19 + $0x11] sm:$0x3] (!%p1260_p10)  ;;  %v172_v21 = vld [vmem:[%s1543_s19 + $0x13] sm:$0x1] (!%p1260_p10)  ;;  %vm211_vm1 = vcmask (!%p1260_p10), 179200   ;;  %vm194_vm2 = vcmask (!%p1260_p10), 1048400  }
  0x28   : > { %v148_v14 = vadd.f32 (!%p1260_p10), %v145_v3, %v142_v6  ;;  %v147_v17 = vld [vmem:[%s1543_s19 + $0x12] sm:$0x3] (!%p1260_p10)  ;;  %v169_v18 = vadd.f32 (!%p1260_p10), %v168_v8, %v167_v10  ;;  %v144_v19 = vadd.f32 (!%p1260_p10), %v141_v16, %v138_v13  ;;  %v149_v23 = vadd.f32 (!%p1260_p10), %v146_v12, %v143_v15  ;;  %s1576_s23 = smov (!%p1260_p10), 0  }
  0x29   : > { %v171_v20 = vld [vmem:[%s1543_s19 + $0x12] sm:$0x1] (!%p1260_p10)  ;;  %v173_v24 = vmul.f32 (!%p1260_p10), 2.0, %v172_v21  ;;  %v218_v35 = vadd.s32 (!%p1260_p10), 128, %v217_v33  ;;  %v219_v36 = vcvt.s32.f32 (!%p1260_p10), %v217_v33  ;;  %vm197_vm3 = vcmask (!%p1260_p10), 1044304  }
  0x2a   : > { %v155_v22 = vrot.slane (!%p1260_p10), %v148_v14, 7  ;;  %170 = vst [vmem:[#allocation2 + $0x8] sm:$0x1] (!%p1260_p10), %v169_v18  ;;  %v150_v25 = vadd.f32 (!%p1260_p10), %v147_v17, %v144_v19  ;;  %v156_v26 = vrot.slane (!%p1260_p10), %v149_v23, 7  ;;  %vm214_vm4 = vcmask (!%p1260_p10), 175104  }
  0x2b   : > { %v174_v27 = vadd.f32 (!%p1260_p10), %v173_v24, %v171_v20  ;;  %v220_v37 = vcvt.s32.f32 (!%p1260_p10), %v218_v35  ;;  %v1568_v38 = vmul.f32 (!%p1260_p10), 3.0, %v219_v36 }
  0x2c   : > { %163 = vst [vmem:[#allocation2 + $0x8] sm:$0xfe] %v155_v22  ;;  %v158_v28 = vrot.slane %v150_v25, 7  ;;  %v157_v29 = vsel %vm154_vm0, %v155_v22, %v156_v26 }
  0x2d   : > { %175 = vst [vmem:[#allocation2 + $0x3b] sm:$0x1] %v174_v27  ;;  %164 = vst [vmem:[#allocation2 + $0x20] sm:$0xff] %v157_v29  ;;  %v1570_v39 = vmul.f32 3.0, %v220_v37  ;;  %v223_v40 = vsub.f32 66.0, %v1568_v38 }
  0x2e   : > { %v159_v30 = vsel %vm154_vm0, %v156_v26, %v158_v28 }
  0x2f   : > { %165 = vst [vmem:[#allocation2 + $0x38] sm:$0x7] %v159_v30  ;;  %v224_v41 = vsub.f32 66.0, %v1570_v39 }
  0x33   : > { %v176_v31 = vld [vmem:[#allocation2 + $0x8] sm:$0xff] }
  0x34   : > { %200 = vperm.xlu1 %1386, %v176_v31   ;;  %181 = vperm.xlu0 %1385, %v176_v31  }
  0x36   : > { %v178_v34 = vld [vmem:[#allocation2 + $0x38] sm:$0xf] }
  0x38   : > { %1387 = vset.pattern.permute.xlu1 %v1423_v5  ;;  %186 = vperm.xlu0 %1385, %v157_v29  }
  0x39   : > { %191 = vperm.xlu1 %1387, %v178_v34  }
  0x3c   : > { %1388 = vset.pattern.permute.xlu0 %v1422_v4 }
  0x3d   : > { %1389 = vset.pattern.permute.xlu1 %v1422_v4  ;;  %204 = vperm.xlu0 %1388, %v157_v29  }
  0x3e   : > { %208 = vperm.xlu1 %1389, %v178_v34  }
  0xb3   : > { %v201_v42 = vpop.permute.xlu1 %200  ;;  %v182_v43 = vpop.permute.xlu0 %181 }
  0xb4   : > { %212 = vst.msk [vmem:[#allocation2 + $0x10] sm:$0xff] %vm211_vm1, %v201_v42 }
  0xb5   : > { %195 = vst.msk [vmem:[#allocation2] sm:$0xff] %vm194_vm2, %v182_v43 }
  0xb7   : > { %v187_v44 = vpop.permute.xlu0 %186 }
  0xb8   : > { %196 = vst.msk [vmem:[#allocation2 + $0x18] sm:$0xff] %vm194_vm2, %v187_v44  ;;  %v192_v45 = vpop.permute.xlu1 %191 }
  0xb9   : > { %198 = vst.msk [vmem:[#allocation2 + $0x30] sm:$0xf] %vm197_vm3, %v192_v45 }
  0xbc   : > { %v205_v46 = vpop.permute.xlu0 %204 }
  0xbd   : > { %v209_v47 = vpop.permute.xlu1 %208  ;;  %213 = vst.msk [vmem:[#allocation2 + $0x28] sm:$0xff] %vm211_vm1, %v205_v46 }
  0xbe   : > { %215 = vst.msk [vmem:[#allocation2 + $0x40] sm:$0xf] %vm214_vm4, %v209_v47 }
  0xbf LB: >> { %s1582_s24 = sshll.u32 %s1418_s23, 3  ;;  %p1262_p11 = scmp.ge.s32.totalorder %s1538_s15, 0  ;;  %s1418_s23 = sphi %s1576_s23, %s230_s23  }
  0xc0   : >> { %s236_s25 = sshra.s32 (!%p1262_p11), %s1582_s24, 3  ;;  %s1424_s28 = smov (!%p1262_p11), 127   ;;  %vm251_vm5 = vcmask (!%p1262_p11), 1039360   ;;  %vm264_vm6 = vcmask (!%p1262_p11), 1031168   ;;  %vm273_vm7 = vcmask (!%p1262_p11), 1022976   ;;  %vm283_vm8 = vcmask (!%p1262_p11), 1014784  }
  0xc1   : >> { %235 = sbr.rel (%p1262_p11) target bundleno = 411 (0x19b), region = 43  ;;  %s1425_s29 = smov (!%p1262_p11), 126   ;;  %vm293_vm9 = vcmask (!%p1262_p11), 1006592   ;;  %vm303_vm10 = vcmask (!%p1262_p11), 998400   ;;  %vm313_vm11 = vcmask (!%p1262_p11), 990208   ;;  %vm323_vm12 = vcmask (!%p1262_p11), 982016  }
  0xc2   : >> { %s1274_s26 = smul.u32 (!%p1262_p11), 24, %s236_s25  ;;  %s1426_s30 = smov (!%p1262_p11), 125   ;;  %vm333_vm13 = vcmask (!%p1262_p11), 973824   ;;  %vm343_vm14 = vcmask (!%p1262_p11), 965632   ;;  %vm353_vm15 = vcmask (!%p1262_p11), 957440   ;;  %vm363_vm0 = vcmask (!%p1262_p11), 949248  }
  0xc3   : >> { %s1427_s3 = smov (!%p1262_p11), 124   ;;  %s1428_s4 = smov (!%p1262_p11), 123   ;;  %vm373_vm2 = vcmask (!%p1262_p11), 941056   ;;  %vm383_vm3 = vcmask (!%p1262_p11), 932864   ;;  %vm393_vm4 = vcmask (!%p1262_p11), 924672  }
  0xc4   : >> { %s240_s27 = scalar_lea.vmem (!%p1262_p11), [#allocation2], %s1274_s26  ;;  %s1429_s5 = smov (!%p1262_p11), 122  }
  0xc5   : >> { %v1588_v48 = vld [vmem:[%s240_s27 + $0x8] sm:$0xff] (!%p1262_p11)  ;;  %v242_v49 = vld [vmem:[%s240_s27 + $0x10] sm:$0xff] (!%p1262_p11)  ;;  %s1430_s6 = smov (!%p1262_p11), 121   ;;  %s1431_s7 = smov (!%p1262_p11), 120  }
  0xc6   : >> { %247 = vrot.lane.b32.xlu0 (!%p1262_p11), %v1588_v48, %s1424_s28  ;;  %v1593_v50 = vsub.f32 (!%p1262_p11), %v1568_v38, %v1588_v48  ;;  %v244_v51 = vsub.f32 (!%p1262_p11), %v1570_v39, %v242_v49  ;;  %s1432_s8 = smov (!%p1262_p11), 119   ;;  %s1433_s9 = smov (!%p1262_p11), 118  }
  0xc7   : >> { %s1434_s10 = smov (!%p1262_p11), 117   ;;  %s1435_s11 = smov (!%p1262_p11), 116  }
  0xc8   : >> { %260 = vrot.lane.b32.xlu1 %v1593_v50, %s1425_s29  ;;  %s1436_s12 = smov 115   ;;  %s1437_s13 = smov 114  }
  0xc9   : >> { %s1438_s0 = smov 113   ;;  %s1439_s16 = smov 112  }
  0xca   : >> { %249 = vrot.lane.b32.xlu0 %v242_v49, %s1424_s28  ;;  %s1440_s17 = smov 111   ;;  %s1441_s18 = smov 110  }
  0xcb   : >> { %s1442_s19 = smov 109   ;;  %s1443_s20 = smov 108  }
  0xcc   : >> { %262 = vrot.lane.b32.xlu1 %v244_v51, %s1425_s29  ;;  %s1444_s21 = smov 107   ;;  %s1445_s25 = smov 106  }
  0xcd   : >> { %s471_s26 = scalar_lea.vmem %s1548_s22, %s1582_s24 }
  0xce   : >> { %269 = vrot.lane.b32.xlu0 %v1593_v50, %s1426_s30 }
  0xd0   : >> { %271 = vrot.lane.b32.xlu1 %v244_v51, %s1426_s30 }
  0xd2   : >> { %279 = vrot.lane.b32.xlu0 %v1593_v50, %s1427_s3 }
  0xd4   : >> { %281 = vrot.lane.b32.xlu1 %v244_v51, %s1427_s3 }
  0xd6   : >> { %289 = vrot.lane.b32.xlu0 %v1593_v50, %s1428_s4 }
  0xd8   : >> { %291 = vrot.lane.b32.xlu1 %v244_v51, %s1428_s4 }
  0xda   : >> { %299 = vrot.lane.b32.xlu0 %v1593_v50, %s1429_s5 }
  0xdc   : >> { %301 = vrot.lane.b32.xlu1 %v244_v51, %s1429_s5 }
  0xde   : >> { %309 = vrot.lane.b32.xlu0 %v1593_v50, %s1430_s6 }
  0xe0   : >> { %311 = vrot.lane.b32.xlu1 %v244_v51, %s1430_s6 }
  0xe2   : >> { %319 = vrot.lane.b32.xlu0 %v1593_v50, %s1431_s7 }
  0xe4   : >> { %321 = vrot.lane.b32.xlu1 %v244_v51, %s1431_s7 }
  0xe6   : >> { %329 = vrot.lane.b32.xlu0 %v1593_v50, %s1432_s8 }
  0xe8   : >> { %331 = vrot.lane.b32.xlu1 %v244_v51, %s1432_s8 }
  0xea   : >> { %339 = vrot.lane.b32.xlu0 %v1593_v50, %s1433_s9 }
  0xec   : >> { %341 = vrot.lane.b32.xlu1 %v244_v51, %s1433_s9 }
  0xee   : >> { %349 = vrot.lane.b32.xlu0 %v1593_v50, %s1434_s10 }
  0xf0   : >> { %351 = vrot.lane.b32.xlu1 %v244_v51, %s1434_s10 }
  0xf2   : >> { %359 = vrot.lane.b32.xlu0 %v1593_v50, %s1435_s11 }
  0xf4   : >> { %361 = vrot.lane.b32.xlu1 %v244_v51, %s1435_s11 }
  0xf6   : >> { %369 = vrot.lane.b32.xlu0 %v1593_v50, %s1436_s12 }
  0xf8   : >> { %371 = vrot.lane.b32.xlu1 %v244_v51, %s1436_s12 }
  0xfa   : >> { %379 = vrot.lane.b32.xlu0 %v1593_v50, %s1437_s13 }
  0xfc   : >> { %381 = vrot.lane.b32.xlu1 %v244_v51, %s1437_s13 }
  0xfe   : >> { %389 = vrot.lane.b32.xlu0 %v1593_v50, %s1438_s0 }
 0x100   : >> { %391 = vrot.lane.b32.xlu1 %v244_v51, %s1438_s0 }
 0x102   : >> { %399 = vrot.lane.b32.xlu0 %v1593_v50, %s1439_s16 }
 0x104   : >> { %401 = vrot.lane.b32.xlu1 %v244_v51, %s1439_s16 }
 0x106   : >> { %409 = vrot.lane.b32.xlu0 %v1593_v50, %s1440_s17 }
 0x108   : >> { %411 = vrot.lane.b32.xlu1 %v244_v51, %s1440_s17 }
 0x10a   : >> { %419 = vrot.lane.b32.xlu0 %v1593_v50, %s1441_s18 }
 0x10c   : >> { %421 = vrot.lane.b32.xlu1 %v244_v51, %s1441_s18 }
 0x10e   : >> { %429 = vrot.lane.b32.xlu0 %v1593_v50, %s1442_s19 }
 0x110   : >> { %431 = vrot.lane.b32.xlu1 %v244_v51, %s1442_s19 }
 0x112   : >> { %439 = vrot.lane.b32.xlu0 %v1593_v50, %s1443_s20 }
 0x114   : >> { %441 = vrot.lane.b32.xlu1 %v244_v51, %s1443_s20 }
 0x116   : >> { %449 = vrot.lane.b32.xlu0 %v1593_v50, %s1444_s21 }
 0x118   : >> { %451 = vrot.lane.b32.xlu1 %v244_v51, %s1444_s21 }
 0x11a   : >> { %459 = vrot.lane.b32.xlu0 %v1593_v50, %s1445_s25 }
 0x11c   : >> { %461 = vrot.lane.b32.xlu1 %v244_v51, %s1445_s25 }
 0x138   : >> { %v248_v52 = vpop.permute.xlu0 %247 }
 0x13a   : >> { %v261_v53 = vpop.permute.xlu1 %260 }
 0x13c   : >> { %v250_v54 = vpop.permute.xlu0 %249 }
 0x13d   : >> { %v252_v1 = vsel %vm251_vm5, %v248_v52, %v250_v54  ;;  %vm403_vm5 = vcmask 916480  }
 0x13e   : >> { %v263_v55 = vpop.permute.xlu1 %262  ;;  %v254_v3 = vadd.f32 %v252_v1, %v1588_v48 }
 0x13f   : >> { %v265_v15 = vsel %vm264_vm6, %v261_v53, %v263_v55  ;;  %vm413_vm6 = vcmask 908288  }
 0x140   : >> { %v270_v56 = vpop.permute.xlu0 %269  ;;  %v255_v6 = vmul.f32 0.5, %v254_v3 }
 0x142   : >> { %v272_v57 = vpop.permute.xlu1 %271  ;;  %v256_v9 = vsub.f32 %v255_v6, %v1568_v38 }
 0x143   : >> { %v274_v16 = vsel %vm273_vm7, %v270_v56, %v272_v57  ;;  %vm423_vm7 = vcmask 900096  }
 0x144   : >> { %v280_v58 = vpop.permute.xlu0 %279  ;;  %v1619_v12 = vadd.f32 -3.0, %v256_v9 }
 0x146   : >> { %v282_v59 = vpop.permute.xlu1 %281  ;;  %v267_v17 = vadd.f32 %v1619_v12, %v265_v15  ;;  %v276_v18 = vadd.f32 %v1619_v12, %v274_v16 }
 0x147   : >> { %v284_v20 = vsel %vm283_vm8, %v280_v58, %v282_v59  ;;  %vm433_vm8 = vcmask 891904  }
 0x148   : >> { %v290_v60 = vpop.permute.xlu0 %289  ;;  %v268_v23 = vand.u32 2147483647, %v267_v17  ;;  %v277_v24 = vand.u32 2147483647, %v276_v18  ;;  %v286_v25 = vadd.f32 %v1619_v12, %v284_v20 }
 0x14a   : >> { %v292_v61 = vpop.permute.xlu1 %291  ;;  %v278_v31 = vmin.f32 %v268_v23, %v277_v24  ;;  %v287_v32 = vand.u32 2147483647, %v286_v25 }
 0x14b   : >> { %v294_v22 = vsel %vm293_vm9, %v290_v60, %v292_v61  ;;  %vm443_vm9 = vcmask 883712  }
 0x14c   : >> { %v300_v62 = vpop.permute.xlu0 %299  ;;  %v296_v28 = vadd.f32 %v1619_v12, %v294_v22  ;;  %v288_v44 = vmin.f32 %v278_v31, %v287_v32 }
 0x14e   : >> { %v302_v63 = vpop.permute.xlu1 %301  ;;  %v297_v36 = vand.u32 2147483647, %v296_v28 }
 0x14f   : >> { %v304_v27 = vsel %vm303_vm10, %v300_v62, %v302_v63  ;;  %vm453_vm10 = vcmask 875520  }
 0x150   : >> { %v310_v0 = vpop.permute.xlu0 %309  ;;  %v306_v33 = vadd.f32 %v1619_v12, %v304_v27  ;;  %v298_v49 = vmin.f32 %v288_v44, %v297_v36 }
 0x152   : >> { %v312_v2 = vpop.permute.xlu1 %311  ;;  %v307_v45 = vand.u32 2147483647, %v306_v33 }
 0x153   : >> { %v314_v30 = vsel %vm313_vm11, %v310_v0, %v312_v2  ;;  %vm463_vm11 = vcmask 867328  }
 0x154   : >> { %v320_v4 = vpop.permute.xlu0 %319  ;;  %v316_v37 = vadd.f32 %v1619_v12, %v314_v30  ;;  %v308_v54 = vmin.f32 %v298_v49, %v307_v45 }
 0x156   : >> { %v322_v5 = vpop.permute.xlu1 %321  ;;  %v317_v50 = vand.u32 2147483647, %v316_v37 }
 0x157   : >> { %v324_v35 = vsel %vm323_vm12, %v320_v4, %v322_v5 }
 0x158   : >> { %v330_v7 = vpop.permute.xlu0 %329  ;;  %v326_v46 = vadd.f32 %v1619_v12, %v324_v35  ;;  %v318_v59 = vmin.f32 %v308_v54, %v317_v50 }
 0x15a   : >> { %v332_v8 = vpop.permute.xlu1 %331  ;;  %v327_v55 = vand.u32 2147483647, %v326_v46 }
 0x15b   : >> { %v334_v43 = vsel %vm333_vm13, %v330_v7, %v332_v8 }
 0x15c   : >> { %v340_v10 = vpop.permute.xlu0 %339  ;;  %v336_v51 = vadd.f32 %v1619_v12, %v334_v43  ;;  %v328_v0 = vmin.f32 %v318_v59, %v327_v55 }
 0x15e   : >> { %v342_v11 = vpop.permute.xlu1 %341  ;;  %v337_v60 = vand.u32 2147483647, %v336_v51 }
 0x15f   : >> { %v344_v48 = vsel %vm343_vm14, %v340_v10, %v342_v11 }
 0x160   : >> { %v350_v13 = vpop.permute.xlu0 %349  ;;  %v346_v56 = vadd.f32 %v1619_v12, %v344_v48  ;;  %v338_v5 = vmin.f32 %v328_v0, %v337_v60 }
 0x162   : >> { %v352_v14 = vpop.permute.xlu1 %351  ;;  %v347_v1 = vand.u32 2147483647, %v346_v56 }
 0x163   : >> { %v354_v53 = vsel %vm353_vm15, %v350_v13, %v352_v14 }
 0x164   : >> { %v360_v19 = vpop.permute.xlu0 %359  ;;  %v356_v61 = vadd.f32 %v1619_v12, %v354_v53  ;;  %v348_v10 = vmin.f32 %v338_v5, %v347_v1 }
 0x166   : >> { %v362_v21 = vpop.permute.xlu1 %361  ;;  %v357_v6 = vand.u32 2147483647, %v356_v61 }
 0x167   : >> { %v364_v58 = vsel %vm363_vm0, %v360_v19, %v362_v21 }
 0x168   : >> { %v370_v26 = vpop.permute.xlu0 %369  ;;  %v366_v2 = vadd.f32 %v1619_v12, %v364_v58  ;;  %v358_v16 = vmin.f32 %v348_v10, %v357_v6 }
 0x16a   : >> { %v372_v29 = vpop.permute.xlu1 %371  ;;  %v367_v11 = vand.u32 2147483647, %v366_v2 }
 0x16b   : >> { %v374_v63 = vsel %vm373_vm2, %v370_v26, %v372_v29 }
 0x16c   : >> { %v380_v34 = vpop.permute.xlu0 %379  ;;  %v376_v7 = vadd.f32 %v1619_v12, %v374_v63  ;;  %v368_v21 = vmin.f32 %v358_v16, %v367_v11 }
 0x16e   : >> { %v382_v42 = vpop.permute.xlu1 %381  ;;  %v377_v17 = vand.u32 2147483647, %v376_v7 }
 0x16f   : >> { %v384_v4 = vsel %vm383_vm3, %v380_v34, %v382_v42 }
 0x170   : >> { %v390_v47 = vpop.permute.xlu0 %389  ;;  %v386_v13 = vadd.f32 %v1619_v12, %v384_v4  ;;  %v378_v26 = vmin.f32 %v368_v21, %v377_v17 }
 0x172   : >> { %v392_v52 = vpop.permute.xlu1 %391  ;;  %v387_v22 = vand.u32 2147483647, %v386_v13 }
 0x173   : >> { %v394_v9 = vsel %vm393_vm4, %v390_v47, %v392_v52 }
 0x174   : >> { %v400_v57 = vpop.permute.xlu0 %399  ;;  %v396_v18 = vadd.f32 %v1619_v12, %v394_v9  ;;  %v388_v31 = vmin.f32 %v378_v26, %v387_v22 }
 0x176   : >> { %v402_v62 = vpop.permute.xlu1 %401  ;;  %v397_v27 = vand.u32 2147483647, %v396_v18 }
 0x177   : >> { %v404_v15 = vsel %vm403_vm5, %v400_v57, %v402_v62 }
 0x178   : >> { %v410_v3 = vpop.permute.xlu0 %409  ;;  %v406_v23 = vadd.f32 %v1619_v12, %v404_v15  ;;  %v398_v35 = vmin.f32 %v388_v31, %v397_v27 }
 0x17a   : >> { %v412_v8 = vpop.permute.xlu1 %411  ;;  %v407_v32 = vand.u32 2147483647, %v406_v23 }
 0x17b   : >> { %v414_v20 = vsel %vm413_vm6, %v410_v3, %v412_v8 }
 0x17c   : >> { %v420_v14 = vpop.permute.xlu0 %419  ;;  %v416_v28 = vadd.f32 %v1619_v12, %v414_v20  ;;  %v408_v44 = vmin.f32 %v398_v35, %v407_v32 }
 0x17e   : >> { %v422_v19 = vpop.permute.xlu1 %421  ;;  %v417_v36 = vand.u32 2147483647, %v416_v28 }
 0x17f   : >> { %v424_v25 = vsel %vm423_vm7, %v420_v14, %v422_v19 }
 0x180   : >> { %v430_v24 = vpop.permute.xlu0 %429  ;;  %v426_v33 = vadd.f32 %v1619_v12, %v424_v25  ;;  %v418_v48 = vmin.f32 %v408_v44, %v417_v36 }
 0x182   : >> { %v432_v29 = vpop.permute.xlu1 %431  ;;  %v427_v45 = vand.u32 2147483647, %v426_v33 }
 0x183   : >> { %v434_v30 = vsel %vm433_vm8, %v430_v24, %v432_v29 }
 0x184   : >> { %v440_v34 = vpop.permute.xlu0 %439  ;;  %v436_v37 = vadd.f32 %v1619_v12, %v434_v30  ;;  %v428_v52 = vmin.f32 %v418_v48, %v427_v45 }
 0x186   : >> { %v442_v42 = vpop.permute.xlu1 %441  ;;  %v437_v49 = vand.u32 2147483647, %v436_v37 }
 0x187   : >> { %v444_v43 = vsel %vm443_vm9, %v440_v34, %v442_v42 }
 0x188   : >> { %v446_v46 = vadd.f32 %v1619_v12, %v444_v43  ;;  %v450_v47 = vpop.permute.xlu0 %449  ;;  %v438_v56 = vmin.f32 %v428_v52, %v437_v49 }
 0x18a   : >> { %v452_v50 = vpop.permute.xlu1 %451  ;;  %v447_v53 = vand.u32 2147483647, %v446_v46 }
 0x18b   : >> { %v454_v51 = vsel %vm453_vm10, %v450_v47, %v452_v50 }
 0x18c   : >> { %v456_v54 = vadd.f32 %v1619_v12, %v454_v51  ;;  %v460_v55 = vpop.permute.xlu0 %459  ;;  %v448_v60 = vmin.f32 %v438_v56, %v447_v53 }
 0x18e   : >> { %v457_v57 = vand.u32 2147483647, %v456_v54  ;;  %v462_v58 = vpop.permute.xlu1 %461 }
 0x18f   : >> { %v464_v59 = vsel %vm463_vm11, %v460_v55, %v462_v58 }
 0x190   : >> { %v466_v61 = vadd.f32 %v1619_v12, %v464_v59  ;;  %v458_v62 = vmin.f32 %v448_v60, %v457_v57 }
 0x192   : >> { %v467_v63 = vand.u32 2147483647, %v466_v61 }
 0x194   : >> { %v468_v0 = vmin.f32 %v458_v62, %v467_v63 }
 0x196   : >> { %v469_v1 = vmul.f32 0.33333334, %v468_v0 }
 0x198   : >> { %v470_v2 = vmin.f32 %v469_v1, 1.0 }
 0x19a   : >> { %472 = vst [vmem:[%s471_s26] sm:$0xff] %v470_v2 }
 0x19b PF: >> { %p1265_p12 = scmp.le.s32.totalorder %s1538_s15, 0 }
 0x19c   : >> { %s477_s27 = sshra.s32 (!%p1265_p12), %s1582_s24, 3  ;;  %s1446_s30 = smov (!%p1265_p12), 1   ;;  %vm499_vm12 = vcmask (!%p1265_p12), 7168   ;;  %vm521_vm13 = vcmask (!%p1265_p12), 891904   ;;  %vm512_vm14 = vcmask (!%p1265_p12), 883712   ;;  %vm531_vm15 = vcmask (!%p1265_p12), 900096  }
 0x19d   : >> { %476 = sbr.rel (%p1265_p12) target bundleno = 745 (0x2e9), region = 47  ;;  %s1447_s3 = smov (!%p1265_p12), 22   ;;  %vm541_vm0 = vcmask (!%p1265_p12), 908288   ;;  %vm551_vm2 = vcmask (!%p1265_p12), 916480   ;;  %vm561_vm3 = vcmask (!%p1265_p12), 924672   ;;  %vm571_vm4 = vcmask (!%p1265_p12), 932864  }
 0x19e   : >> { %s1275_s28 = smul.u32 (!%p1265_p12), 24, %s477_s27  ;;  %s1448_s4 = smov (!%p1265_p12), 108   ;;  %vm581_vm5 = vcmask (!%p1265_p12), 941056   ;;  %vm591_vm6 = vcmask (!%p1265_p12), 949248   ;;  %vm601_vm7 = vcmask (!%p1265_p12), 957440   ;;  %vm611_vm8 = vcmask (!%p1265_p12), 965632  }
 0x19f   : >> { %s1449_s5 = smov (!%p1265_p12), 109   ;;  %s1450_s6 = smov (!%p1265_p12), 110   ;;  %vm621_vm9 = vcmask (!%p1265_p12), 973824   ;;  %vm631_vm10 = vcmask (!%p1265_p12), 982016   ;;  %vm641_vm11 = vcmask (!%p1265_p12), 990208  }
 0x1a0   : >> { %s481_s29 = scalar_lea.vmem (!%p1265_p12), [#allocation2], %s1275_s28  ;;  %s1451_s7 = smov (!%p1265_p12), 111  }
 0x1a1   : >> { %v482_v3 = vld [vmem:[%s481_s29] sm:$0xff] (!%p1265_p12)  ;;  %v1648_v12 = vld [vmem:[%s481_s29 + $0x8] sm:$0xff] (!%p1265_p12)  ;;  %s1452_s8 = smov (!%p1265_p12), 112   ;;  %s1453_s9 = smov (!%p1265_p12), 113  }
 0x1a2   : >> { %495 = vrot.lane.b32.xlu1 (!%p1265_p12), %v482_v3, %s1446_s30  ;;  %486 = vrot.lane.b32.xlu0 (!%p1265_p12), %v482_v3, %s1447_s3  ;;  %s1454_s10 = smov (!%p1265_p12), 114   ;;  %s1455_s11 = smov (!%p1265_p12), 115  }
 0x1a3   : >> { %s1456_s12 = smov (!%p1265_p12), 116   ;;  %s1457_s13 = smov (!%p1265_p12), 117  }
 0x1a4   : >> { %s1458_s0 = smov 118   ;;  %s1459_s16 = smov 119  }
 0x1a5   : >> { %s1460_s17 = smov 120   ;;  %s1461_s18 = smov 121  }
 0x1a6   : >> { %497 = vrot.lane.b32.xlu1 %v1648_v12, %s1446_s30  ;;  %488 = vrot.lane.b32.xlu0 %v1648_v12, %s1447_s3  ;;  %s1462_s19 = smov 122   ;;  %s1463_s20 = smov 123  }
 0x1a7   : >> { %s1464_s21 = smov 124   ;;  %s1465_s25 = smov 125  }
 0x1a8   : >> { %s1466_s26 = smov 126   ;;  %s1467_s27 = smov 127  }
 0x1a9   : >> { %s712_s28 = scalar_lea.vmem %s1548_s22, %s1582_s24 }
 0x214   : >> { %v487_v4 = vpop.permute.xlu0 %486  ;;  %v496_v9 = vpop.permute.xlu1 %495 }
 0x218   : >> { %v489_v5 = vpop.permute.xlu0 %488  ;;  %v498_v10 = vpop.permute.xlu1 %497 }
 0x219   : >> { %v490_v6 = vsel %vm211_vm1, %v487_v4, %v489_v5  ;;  %v494_v7 = vsub.f32 %v224_v41, %v489_v5  ;;  %v500_v24 = vsel %vm499_vm12, %v496_v9, %v498_v10  ;;  %vm651_vm12 = vcmask 998400  }
 0x21a   : >> { %v1657_v8 = vsub.f32 %v223_v40, %v490_v6  ;;  %v502_v26 = vadd.f32 %v500_v24, %v1648_v12 }
 0x21b   : >> { %510 = vrot.lane.b32.xlu1 %v494_v7, %s1448_s4 }
 0x21c   : >> { %508 = vrot.lane.b32.xlu0 %v1657_v8, %s1448_s4  ;;  %v503_v29 = vmul.f32 0.5, %v502_v26 }
 0x21e   : >> { %v504_v32 = vadd.f32 %v503_v29, %v1568_v38 }
 0x21f   : >> { %519 = vrot.lane.b32.xlu1 %v494_v7, %s1449_s5 }
 0x220   : >> { %517 = vrot.lane.b32.xlu0 %v1657_v8, %s1449_s5  ;;  %v1681_v36 = vadd.f32 -3.0, %v504_v32 }
 0x223   : >> { %529 = vrot.lane.b32.xlu1 %v494_v7, %s1450_s6 }
 0x224   : >> { %527 = vrot.lane.b32.xlu0 %v1657_v8, %s1450_s6 }
 0x227   : >> { %539 = vrot.lane.b32.xlu1 %v494_v7, %s1451_s7 }
 0x228   : >> { %537 = vrot.lane.b32.xlu0 %v1657_v8, %s1451_s7 }
 0x22b   : >> { %549 = vrot.lane.b32.xlu1 %v494_v7, %s1452_s8 }
 0x22c   : >> { %547 = vrot.lane.b32.xlu0 %v1657_v8, %s1452_s8 }
 0x22f   : >> { %559 = vrot.lane.b32.xlu1 %v494_v7, %s1453_s9 }
 0x230   : >> { %557 = vrot.lane.b32.xlu0 %v1657_v8, %s1453_s9 }
 0x233   : >> { %569 = vrot.lane.b32.xlu1 %v494_v7, %s1454_s10 }
 0x234   : >> { %567 = vrot.lane.b32.xlu0 %v1657_v8, %s1454_s10 }
 0x237   : >> { %579 = vrot.lane.b32.xlu1 %v494_v7, %s1455_s11 }
 0x238   : >> { %577 = vrot.lane.b32.xlu0 %v1657_v8, %s1455_s11 }
 0x23b   : >> { %589 = vrot.lane.b32.xlu1 %v494_v7, %s1456_s12 }
 0x23c   : >> { %587 = vrot.lane.b32.xlu0 %v1657_v8, %s1456_s12 }
 0x23f   : >> { %599 = vrot.lane.b32.xlu1 %v494_v7, %s1457_s13 }
 0x240   : >> { %597 = vrot.lane.b32.xlu0 %v1657_v8, %s1457_s13 }
 0x243   : >> { %609 = vrot.lane.b32.xlu1 %v494_v7, %s1458_s0 }
 0x244   : >> { %607 = vrot.lane.b32.xlu0 %v1657_v8, %s1458_s0 }
 0x247   : >> { %619 = vrot.lane.b32.xlu1 %v494_v7, %s1459_s16 }
 0x248   : >> { %617 = vrot.lane.b32.xlu0 %v1657_v8, %s1459_s16 }
 0x24b   : >> { %629 = vrot.lane.b32.xlu1 %v494_v7, %s1460_s17 }
 0x24c   : >> { %627 = vrot.lane.b32.xlu0 %v1657_v8, %s1460_s17 }
 0x24f   : >> { %639 = vrot.lane.b32.xlu1 %v494_v7, %s1461_s18 }
 0x250   : >> { %637 = vrot.lane.b32.xlu0 %v1657_v8, %s1461_s18 }
 0x253   : >> { %649 = vrot.lane.b32.xlu1 %v494_v7, %s1462_s19 }
 0x254   : >> { %647 = vrot.lane.b32.xlu0 %v1657_v8, %s1462_s19 }
 0x257   : >> { %659 = vrot.lane.b32.xlu1 %v494_v7, %s1463_s20 }
 0x258   : >> { %657 = vrot.lane.b32.xlu0 %v1657_v8, %s1463_s20 }
 0x25b   : >> { %669 = vrot.lane.b32.xlu1 %v494_v7, %s1464_s21 }
 0x25c   : >> { %667 = vrot.lane.b32.xlu0 %v1657_v8, %s1464_s21 }
 0x25f   : >> { %679 = vrot.lane.b32.xlu1 %v494_v7, %s1465_s25 }
 0x260   : >> { %677 = vrot.lane.b32.xlu0 %v1657_v8, %s1465_s25 }
 0x263   : >> { %689 = vrot.lane.b32.xlu1 %v494_v7, %s1466_s26 }
 0x264   : >> { %687 = vrot.lane.b32.xlu0 %v1657_v8, %s1466_s26 }
 0x267   : >> { %699 = vrot.lane.b32.xlu1 %v494_v7, %s1467_s27 }
 0x268   : >> { %697 = vrot.lane.b32.xlu0 %v1657_v8, %s1467_s27 }
 0x28d   : >> { %v511_v11 = vpop.permute.xlu1 %510 }
 0x28e   : >> { %v509_v13 = vpop.permute.xlu0 %508 }
 0x28f   : >> { %v513_v42 = vsel %vm512_vm14, %v509_v13, %v511_v11  ;;  %vm671_vm14 = vcmask 1014784  }
 0x290   : >> { %v515_v47 = vadd.f32 %v1681_v36, %v513_v42 }
 0x291   : >> { %v520_v14 = vpop.permute.xlu1 %519 }
 0x292   : >> { %v518_v15 = vpop.permute.xlu0 %517  ;;  %v516_v55 = vand.u32 2147483647, %v515_v47 }
 0x293   : >> { %v522_v34 = vsel %vm521_vm13, %v518_v15, %v520_v14  ;;  %vm661_vm13 = vcmask 1006592  }
 0x294   : >> { %v524_v44 = vadd.f32 %v1681_v36, %v522_v34 }
 0x295   : >> { %v530_v16 = vpop.permute.xlu1 %529 }
 0x296   : >> { %v528_v17 = vpop.permute.xlu0 %527  ;;  %v525_v51 = vand.u32 2147483647, %v524_v44 }
 0x297   : >> { %v532_v43 = vsel %vm531_vm15, %v528_v17, %v530_v16  ;;  %vm681_vm15 = vcmask 1022976  }
 0x298   : >> { %v534_v48 = vadd.f32 %v1681_v36, %v532_v43  ;;  %v526_v60 = vmin.f32 %v516_v55, %v525_v51 }
 0x299   : >> { %v540_v18 = vpop.permute.xlu1 %539 }
 0x29a   : >> { %v538_v19 = vpop.permute.xlu0 %537  ;;  %v535_v56 = vand.u32 2147483647, %v534_v48 }
 0x29b   : >> { %v542_v45 = vsel %vm541_vm0, %v538_v19, %v540_v18  ;;  %vm691_vm0 = vcmask 1031168  }
 0x29c   : >> { %v544_v52 = vadd.f32 %v1681_v36, %v542_v45  ;;  %v536_v1 = vmin.f32 %v526_v60, %v535_v56 }
 0x29d   : >> { %v550_v20 = vpop.permute.xlu1 %549 }
 0x29e   : >> { %v548_v21 = vpop.permute.xlu0 %547  ;;  %v545_v61 = vand.u32 2147483647, %v544_v52 }
 0x29f   : >> { %v552_v50 = vsel %vm551_vm2, %v548_v21, %v550_v20  ;;  %vm701_vm2 = vcmask 1039360  }
 0x2a0   : >> { %v554_v57 = vadd.f32 %v1681_v36, %v552_v50  ;;  %v546_v5 = vmin.f32 %v536_v1, %v545_v61 }
 0x2a1   : >> { %v560_v22 = vpop.permute.xlu1 %559 }
 0x2a2   : >> { %v558_v23 = vpop.permute.xlu0 %557  ;;  %v555_v2 = vand.u32 2147483647, %v554_v57 }
 0x2a3   : >> { %v562_v53 = vsel %vm561_vm3, %v558_v23, %v560_v22 }
 0x2a4   : >> { %v564_v62 = vadd.f32 %v1681_v36, %v562_v53  ;;  %v556_v11 = vmin.f32 %v546_v5, %v555_v2 }
 0x2a5   : >> { %v570_v25 = vpop.permute.xlu1 %569 }
 0x2a6   : >> { %v568_v27 = vpop.permute.xlu0 %567  ;;  %v565_v6 = vand.u32 2147483647, %v564_v62 }
 0x2a7   : >> { %v572_v59 = vsel %vm571_vm4, %v568_v27, %v570_v25 }
 0x2a8   : >> { %v574_v3 = vadd.f32 %v1681_v36, %v572_v59  ;;  %v566_v17 = vmin.f32 %v556_v11, %v565_v6 }
 0x2a9   : >> { %v580_v28 = vpop.permute.xlu1 %579 }
 0x2aa   : >> { %v578_v30 = vpop.permute.xlu0 %577  ;;  %v575_v13 = vand.u32 2147483647, %v574_v3 }
 0x2ab   : >> { %v582_v63 = vsel %vm581_vm5, %v578_v30, %v580_v28 }
 0x2ac   : >> { %v584_v7 = vadd.f32 %v1681_v36, %v582_v63  ;;  %v576_v22 = vmin.f32 %v566_v17, %v575_v13 }
 0x2ad   : >> { %v590_v31 = vpop.permute.xlu1 %589 }
 0x2ae   : >> { %v588_v33 = vpop.permute.xlu0 %587  ;;  %v585_v18 = vand.u32 2147483647, %v584_v7 }
 0x2af   : >> { %v592_v4 = vsel %vm591_vm6, %v588_v33, %v590_v31 }
 0x2b0   : >> { %v594_v14 = vadd.f32 %v1681_v36, %v592_v4  ;;  %v586_v27 = vmin.f32 %v576_v22, %v585_v18 }
 0x2b1   : >> { %v600_v35 = vpop.permute.xlu1 %599 }
 0x2b2   : >> { %v598_v37 = vpop.permute.xlu0 %597  ;;  %v595_v23 = vand.u32 2147483647, %v594_v14 }
 0x2b3   : >> { %v602_v9 = vsel %vm601_vm7, %v598_v37, %v600_v35 }
 0x2b4   : >> { %v604_v19 = vadd.f32 %v1681_v36, %v602_v9  ;;  %v596_v32 = vmin.f32 %v586_v27, %v595_v23 }
 0x2b5   : >> { %v610_v46 = vpop.permute.xlu1 %609 }
 0x2b6   : >> { %v608_v49 = vpop.permute.xlu0 %607  ;;  %v605_v28 = vand.u32 2147483647, %v604_v19 }
 0x2b7   : >> { %v612_v16 = vsel %vm611_vm8, %v608_v49, %v610_v46 }
 0x2b8   : >> { %v614_v24 = vadd.f32 %v1681_v36, %v612_v16  ;;  %v606_v42 = vmin.f32 %v596_v32, %v605_v28  ;;  %v707_v16 = vadd.f32 %v1681_v36, %v1657_v8 }
 0x2b9   : >> { %v620_v54 = vpop.permute.xlu1 %619 }
 0x2ba   : >> { %v618_v58 = vpop.permute.xlu0 %617  ;;  %v615_v33 = vand.u32 2147483647, %v614_v24 }
 0x2bb   : >> { %v622_v20 = vsel %vm621_vm9, %v618_v58, %v620_v54 }
 0x2bc   : >> { %v624_v29 = vadd.f32 %v1681_v36, %v622_v20  ;;  %v616_v47 = vmin.f32 %v606_v42, %v615_v33  ;;  %v708_v20 = vand.u32 2147483647, %v707_v16 }
 0x2bd   : >> { %v630_v0 = vpop.permute.xlu1 %629 }
 0x2be   : >> { %v628_v12 = vpop.permute.xlu0 %627  ;;  %v625_v43 = vand.u32 2147483647, %v624_v29 }
 0x2bf   : >> { %v632_v26 = vsel %vm631_vm10, %v628_v12, %v630_v0 }
 0x2c0   : >> { %v634_v34 = vadd.f32 %v1681_v36, %v632_v26  ;;  %v626_v52 = vmin.f32 %v616_v47, %v625_v43 }
 0x2c1   : >> { %v640_v10 = vpop.permute.xlu1 %639 }
 0x2c2   : >> { %v638_v15 = vpop.permute.xlu0 %637  ;;  %v635_v48 = vand.u32 2147483647, %v634_v34 }
 0x2c3   : >> { %v642_v30 = vsel %vm641_vm11, %v638_v15, %v640_v10 }
 0x2c4   : >> { %v644_v44 = vadd.f32 %v1681_v36, %v642_v30  ;;  %v636_v56 = vmin.f32 %v626_v52, %v635_v48 }
 0x2c5   : >> { %v650_v21 = vpop.permute.xlu1 %649 }
 0x2c6   : >> { %v648_v25 = vpop.permute.xlu0 %647  ;;  %v645_v53 = vand.u32 2147483647, %v644_v44 }
 0x2c7   : >> { %v652_v37 = vsel %vm651_vm12, %v648_v25, %v650_v21 }
 0x2c8   : >> { %v654_v49 = vadd.f32 %v1681_v36, %v652_v37  ;;  %v646_v61 = vmin.f32 %v636_v56, %v645_v53 }
 0x2c9   : >> { %v660_v31 = vpop.permute.xlu1 %659 }
 0x2ca   : >> { %v658_v35 = vpop.permute.xlu0 %657  ;;  %v655_v57 = vand.u32 2147483647, %v654_v49 }
 0x2cb   : >> { %v662_v45 = vsel %vm661_vm13, %v658_v35, %v660_v31 }
 0x2cc   : >> { %v664_v54 = vadd.f32 %v1681_v36, %v662_v45  ;;  %v656_v1 = vmin.f32 %v646_v61, %v655_v57 }
 0x2cd   : >> { %v670_v46 = vpop.permute.xlu1 %669 }
 0x2ce   : >> { %v668_v50 = vpop.permute.xlu0 %667  ;;  %v665_v62 = vand.u32 2147483647, %v664_v54 }
 0x2cf   : >> { %v672_v51 = vsel %vm671_vm14, %v668_v50, %v670_v46 }
 0x2d0   : >> { %v674_v58 = vadd.f32 %v1681_v36, %v672_v51  ;;  %v666_v4 = vmin.f32 %v656_v1, %v665_v62 }
 0x2d1   : >> { %v680_v55 = vpop.permute.xlu1 %679 }
 0x2d2   : >> { %v678_v59 = vpop.permute.xlu0 %677  ;;  %v675_v2 = vand.u32 2147483647, %v674_v58 }
 0x2d3   : >> { %v682_v60 = vsel %vm681_vm15, %v678_v59, %v680_v55 }
 0x2d4   : >> { %v684_v63 = vadd.f32 %v1681_v36, %v682_v60  ;;  %v676_v9 = vmin.f32 %v666_v4, %v675_v2 }
 0x2d5   : >> { %v690_v0 = vpop.permute.xlu1 %689 }
 0x2d6   : >> { %v688_v3 = vpop.permute.xlu0 %687  ;;  %v685_v5 = vand.u32 2147483647, %v684_v63 }
 0x2d7   : >> { %v692_v12 = vsel %vm691_vm0, %v688_v3, %v690_v0 }
 0x2d8   : >> { %v694_v6 = vadd.f32 %v1681_v36, %v692_v12  ;;  %v686_v14 = vmin.f32 %v676_v9, %v685_v5 }
 0x2d9   : >> { %v700_v7 = vpop.permute.xlu1 %699 }
 0x2da   : >> { %v695_v10 = vand.u32 2147483647, %v694_v6  ;;  %v698_v11 = vpop.permute.xlu0 %697 }
 0x2db   : >> { %v702_v13 = vsel %vm701_vm2, %v698_v11, %v700_v7 }
 0x2dc   : >> { %v704_v15 = vadd.f32 %v1681_v36, %v702_v13  ;;  %v696_v17 = vmin.f32 %v686_v14, %v695_v10 }
 0x2de   : >> { %v705_v18 = vand.u32 2147483647, %v704_v15 }
 0x2e0   : >> { %v706_v19 = vmin.f32 %v696_v17, %v705_v18 }
 0x2e2   : >> { %v709_v21 = vmin.f32 %v706_v19, %v708_v20 }
 0x2e4   : >> { %v710_v22 = vmul.f32 0.33333334, %v709_v21 }
 0x2e6   : >> { %v711_v23 = vmin.f32 %v710_v22, 1.0 }
 0x2e8   : >> { %713 = vst [vmem:[%s712_s28] sm:$0xff] %v711_v23 }
 0x2e9 PF: >> { %s230_s23 = sadd.s32 1, %s1418_s23  }
 0x2ea   : >> { %p227_p13 = scmp.ge.s32.totalorder %s230_s23, 2  }
 0x2ec   : > { %229 = sbr.rel (!%p227_p13) target bundleno = 191 (0xbf), region = 89 }
 0x2f3   : > { %717 = sbr.rel (%p1262_p11) target bundleno = 969 (0x3c9), region = 51  ;;  %v1712_v8 = vld [vmem:[#allocation2 + $0x38] sm:$0xf] (!%p1262_p11)  ;;  %v719_v36 = vld [vmem:[#allocation2 + $0x40] sm:$0xf] (!%p1262_p11)  ;;  %s1468_s29 = smov (!%p1262_p11), 127  }
 0x2f4   : > { %724 = vrot.lane.b32.xlu0 (!%p1262_p11), %v1712_v8, %s1468_s29  ;;  %v1717_v24 = vsub.f32 (!%p1262_p11), %v1568_v38, %v1712_v8  ;;  %s1469_s24 = smov (!%p1262_p11), 126   ;;  %v721_v25 = vsub.f32 (!%p1262_p11), %v1570_v39, %v719_v36  ;;  %s1470_s23 = smov (!%p1262_p11), 125   ;;  %vm728_vm3 = vcmask (!%p1262_p11), 1039360   ;;  %vm741_vm4 = vcmask (!%p1262_p11), 1031168  }
 0x2f5   : > { %s1471_s30 = smov (!%p1262_p11), 124   ;;  %s1472_s3 = smov (!%p1262_p11), 123   ;;  %vm750_vm5 = vcmask (!%p1262_p11), 1022976   ;;  %vm760_vm6 = vcmask (!%p1262_p11), 1014784   ;;  %vm770_vm7 = vcmask (!%p1262_p11), 1006592   ;;  %vm780_vm8 = vcmask (!%p1262_p11), 998400  }
 0x2f6   : > { %737 = vrot.lane.b32.xlu1 (!%p1262_p11), %v1717_v24, %s1469_s24  ;;  %s1473_s4 = smov (!%p1262_p11), 122   ;;  %s1474_s5 = smov (!%p1262_p11), 121   ;;  %vm790_vm9 = vcmask (!%p1262_p11), 990208   ;;  %vm800_vm10 = vcmask (!%p1262_p11), 982016   ;;  %vm810_vm11 = vcmask (!%p1262_p11), 973824   ;;  %vm820_vm12 = vcmask (!%p1262_p11), 965632  }
 0x2f7   : > { %s1475_s6 = smov (!%p1262_p11), 120   ;;  %s1476_s7 = smov (!%p1262_p11), 119   ;;  %vm830_vm13 = vcmask (!%p1262_p11), 957440   ;;  %vm840_vm14 = vcmask (!%p1262_p11), 949248   ;;  %vm850_vm15 = vcmask (!%p1262_p11), 941056   ;;  %vm860_vm0 = vcmask (!%p1262_p11), 932864  }
 0x2f8   : > { %726 = vrot.lane.b32.xlu0 (!%p1262_p11), %v719_v36, %s1468_s29  ;;  %s1477_s8 = smov (!%p1262_p11), 118   ;;  %s1478_s9 = smov (!%p1262_p11), 117   ;;  %vm870_vm2 = vcmask (!%p1262_p11), 924672  }
 0x2f9   : > { %s1479_s10 = smov (!%p1262_p11), 116   ;;  %s1480_s11 = smov (!%p1262_p11), 115  }
 0x2fa   : > { %739 = vrot.lane.b32.xlu1 %v721_v25, %s1469_s24  ;;  %s1481_s12 = smov 114   ;;  %s1482_s13 = smov 113  }
 0x2fb   : > { %s1483_s0 = smov 112   ;;  %s1484_s16 = smov 111  }
 0x2fc   : > { %746 = vrot.lane.b32.xlu0 %v1717_v24, %s1470_s23  ;;  %s1485_s17 = smov 110   ;;  %s1486_s18 = smov 109  }
 0x2fd   : > { %s1487_s19 = smov 108   ;;  %s1488_s20 = smov 107  }
 0x2fe   : > { %748 = vrot.lane.b32.xlu1 %v721_v25, %s1470_s23  ;;  %s1489_s21 = smov 106  }
 0x300   : > { %756 = vrot.lane.b32.xlu0 %v1717_v24, %s1471_s30 }
 0x302   : > { %758 = vrot.lane.b32.xlu1 %v721_v25, %s1471_s30 }
 0x304   : > { %766 = vrot.lane.b32.xlu0 %v1717_v24, %s1472_s3 }
 0x306   : > { %768 = vrot.lane.b32.xlu1 %v721_v25, %s1472_s3 }
 0x308   : > { %776 = vrot.lane.b32.xlu0 %v1717_v24, %s1473_s4 }
 0x30a   : > { %778 = vrot.lane.b32.xlu1 %v721_v25, %s1473_s4 }
 0x30c   : > { %786 = vrot.lane.b32.xlu0 %v1717_v24, %s1474_s5 }
 0x30e   : > { %788 = vrot.lane.b32.xlu1 %v721_v25, %s1474_s5 }
 0x310   : > { %796 = vrot.lane.b32.xlu0 %v1717_v24, %s1475_s6 }
 0x312   : > { %798 = vrot.lane.b32.xlu1 %v721_v25, %s1475_s6 }
 0x314   : > { %806 = vrot.lane.b32.xlu0 %v1717_v24, %s1476_s7 }
 0x316   : > { %808 = vrot.lane.b32.xlu1 %v721_v25, %s1476_s7 }
 0x318   : > { %816 = vrot.lane.b32.xlu0 %v1717_v24, %s1477_s8 }
 0x31a   : > { %818 = vrot.lane.b32.xlu1 %v721_v25, %s1477_s8 }
 0x31c   : > { %826 = vrot.lane.b32.xlu0 %v1717_v24, %s1478_s9 }
 0x31e   : > { %828 = vrot.lane.b32.xlu1 %v721_v25, %s1478_s9 }
 0x320   : > { %836 = vrot.lane.b32.xlu0 %v1717_v24, %s1479_s10 }
 0x322   : > { %838 = vrot.lane.b32.xlu1 %v721_v25, %s1479_s10 }
 0x324   : > { %846 = vrot.lane.b32.xlu0 %v1717_v24, %s1480_s11 }
 0x326   : > { %848 = vrot.lane.b32.xlu1 %v721_v25, %s1480_s11 }
 0x328   : > { %856 = vrot.lane.b32.xlu0 %v1717_v24, %s1481_s12 }
 0x32a   : > { %858 = vrot.lane.b32.xlu1 %v721_v25, %s1481_s12 }
 0x32c   : > { %866 = vrot.lane.b32.xlu0 %v1717_v24, %s1482_s13 }
 0x32e   : > { %868 = vrot.lane.b32.xlu1 %v721_v25, %s1482_s13 }
 0x330   : > { %876 = vrot.lane.b32.xlu0 %v1717_v24, %s1483_s0 }
 0x332   : > { %878 = vrot.lane.b32.xlu1 %v721_v25, %s1483_s0 }
 0x334   : > { %886 = vrot.lane.b32.xlu0 %v1717_v24, %s1484_s16 }
 0x336   : > { %888 = vrot.lane.b32.xlu1 %v721_v25, %s1484_s16 }
 0x338   : > { %896 = vrot.lane.b32.xlu0 %v1717_v24, %s1485_s17 }
 0x33a   : > { %898 = vrot.lane.b32.xlu1 %v721_v25, %s1485_s17 }
 0x33c   : > { %906 = vrot.lane.b32.xlu0 %v1717_v24, %s1486_s18 }
 0x33e   : > { %908 = vrot.lane.b32.xlu1 %v721_v25, %s1486_s18 }
 0x340   : > { %916 = vrot.lane.b32.xlu0 %v1717_v24, %s1487_s19 }
 0x342   : > { %918 = vrot.lane.b32.xlu1 %v721_v25, %s1487_s19 }
 0x344   : > { %926 = vrot.lane.b32.xlu0 %v1717_v24, %s1488_s20 }
 0x346   : > { %928 = vrot.lane.b32.xlu1 %v721_v25, %s1488_s20 }
 0x348   : > { %936 = vrot.lane.b32.xlu0 %v1717_v24, %s1489_s21 }
 0x34a   : > { %938 = vrot.lane.b32.xlu1 %v721_v25, %s1489_s21 }
 0x366   : > { %v725_v26 = vpop.permute.xlu0 %724 }
 0x368   : > { %v738_v27 = vpop.permute.xlu1 %737 }
 0x36a   : > { %v727_v28 = vpop.permute.xlu0 %726 }
 0x36b   : > { %v729_v44 = vsel %vm728_vm3, %v725_v26, %v727_v28  ;;  %vm880_vm3 = vcmask 916480  }
 0x36c   : > { %v740_v29 = vpop.permute.xlu1 %739  ;;  %v731_v46 = vadd.f32 %v729_v44, %v1712_v8 }
 0x36d   : > { %v742_v58 = vsel %vm741_vm4, %v738_v27, %v740_v29  ;;  %vm890_vm4 = vcmask 908288  }
 0x36e   : > { %v747_v30 = vpop.permute.xlu0 %746  ;;  %v732_v49 = vmul.f32 0.5, %v731_v46 }
 0x370   : > { %v749_v31 = vpop.permute.xlu1 %748  ;;  %v733_v52 = vsub.f32 %v732_v49, %v1568_v38 }
 0x371   : > { %v751_v59 = vsel %vm750_vm5, %v747_v30, %v749_v31  ;;  %vm900_vm5 = vcmask 900096  }
 0x372   : > { %v757_v32 = vpop.permute.xlu0 %756  ;;  %v1743_v55 = vadd.f32 -3.0, %v733_v52 }
 0x374   : > { %v759_v33 = vpop.permute.xlu1 %758  ;;  %v744_v60 = vadd.f32 %v1743_v55, %v742_v58  ;;  %v753_v61 = vadd.f32 %v1743_v55, %v751_v59 }
 0x375   : > { %v761_v63 = vsel %vm760_vm6, %v757_v32, %v759_v33  ;;  %vm910_vm6 = vcmask 891904  }
 0x376   : > { %v767_v34 = vpop.permute.xlu0 %766  ;;  %v745_v2 = vand.u32 2147483647, %v744_v60  ;;  %v754_v3 = vand.u32 2147483647, %v753_v61  ;;  %v763_v12 = vadd.f32 %v1743_v55, %v761_v63 }
 0x378   : > { %v769_v35 = vpop.permute.xlu1 %768  ;;  %v755_v10 = vmin.f32 %v745_v2, %v754_v3  ;;  %v764_v11 = vand.u32 2147483647, %v763_v12 }
 0x379   : > { %v771_v1 = vsel %vm770_vm7, %v767_v34, %v769_v35  ;;  %vm920_vm7 = vcmask 883712  }
 0x37a   : > { %v777_v37 = vpop.permute.xlu0 %776  ;;  %v773_v6 = vadd.f32 %v1743_v55, %v771_v1  ;;  %v765_v20 = vmin.f32 %v755_v10, %v764_v11 }
 0x37c   : > { %v779_v42 = vpop.permute.xlu1 %778  ;;  %v774_v16 = vand.u32 2147483647, %v773_v6 }
 0x37d   : > { %v781_v5 = vsel %vm780_vm8, %v777_v37, %v779_v42  ;;  %vm930_vm8 = vcmask 875520  }
 0x37e   : > { %v787_v43 = vpop.permute.xlu0 %786  ;;  %v783_v13 = vadd.f32 %v1743_v55, %v781_v5  ;;  %v775_v36 = vmin.f32 %v765_v20, %v774_v16 }
 0x380   : > { %v789_v45 = vpop.permute.xlu1 %788  ;;  %v784_v21 = vand.u32 2147483647, %v783_v13 }
 0x381   : > { %v791_v9 = vsel %vm790_vm9, %v787_v43, %v789_v45  ;;  %vm940_vm9 = vcmask 867328  }
 0x382   : > { %v797_v47 = vpop.permute.xlu0 %796  ;;  %v793_v17 = vadd.f32 %v1743_v55, %v791_v9  ;;  %v785_v28 = vmin.f32 %v775_v36, %v784_v21 }
 0x384   : > { %v799_v48 = vpop.permute.xlu1 %798  ;;  %v794_v24 = vand.u32 2147483647, %v793_v17 }
 0x385   : > { %v801_v15 = vsel %vm800_vm10, %v797_v47, %v799_v48 }
 0x386   : > { %v807_v50 = vpop.permute.xlu0 %806  ;;  %v803_v22 = vadd.f32 %v1743_v55, %v801_v15  ;;  %v795_v33 = vmin.f32 %v785_v28, %v794_v24 }
 0x388   : > { %v809_v51 = vpop.permute.xlu1 %808  ;;  %v804_v29 = vand.u32 2147483647, %v803_v22 }
 0x389   : > { %v811_v19 = vsel %vm810_vm11, %v807_v50, %v809_v51 }
 0x38a   : > { %v817_v53 = vpop.permute.xlu0 %816  ;;  %v813_v25 = vadd.f32 %v1743_v55, %v811_v19  ;;  %v805_v43 = vmin.f32 %v795_v33, %v804_v29 }
 0x38c   : > { %v819_v54 = vpop.permute.xlu1 %818  ;;  %v814_v34 = vand.u32 2147483647, %v813_v25 }
 0x38d   : > { %v821_v8 = vsel %vm820_vm12, %v817_v53, %v819_v54 }
 0x38e   : > { %v827_v56 = vpop.permute.xlu0 %826  ;;  %v823_v30 = vadd.f32 %v1743_v55, %v821_v8  ;;  %v815_v48 = vmin.f32 %v805_v43, %v814_v34 }
 0x390   : > { %v829_v57 = vpop.permute.xlu1 %828  ;;  %v824_v44 = vand.u32 2147483647, %v823_v30 }
 0x391   : > { %v831_v27 = vsel %vm830_vm13, %v827_v56, %v829_v57 }
 0x392   : > { %v837_v62 = vpop.permute.xlu0 %836  ;;  %v833_v35 = vadd.f32 %v1743_v55, %v831_v27  ;;  %v825_v53 = vmin.f32 %v815_v48, %v824_v44 }
 0x394   : > { %v839_v0 = vpop.permute.xlu1 %838  ;;  %v834_v49 = vand.u32 2147483647, %v833_v35 }
 0x395   : > { %v841_v32 = vsel %vm840_vm14, %v837_v62, %v839_v0 }
 0x396   : > { %v847_v4 = vpop.permute.xlu0 %846  ;;  %v843_v45 = vadd.f32 %v1743_v55, %v841_v32  ;;  %v835_v59 = vmin.f32 %v825_v53, %v834_v49 }
 0x398   : > { %v849_v7 = vpop.permute.xlu1 %848  ;;  %v844_v54 = vand.u32 2147483647, %v843_v45 }
 0x399   : > { %v851_v42 = vsel %vm850_vm15, %v847_v4, %v849_v7 }
 0x39a   : > { %v857_v14 = vpop.permute.xlu0 %856  ;;  %v853_v50 = vadd.f32 %v1743_v55, %v851_v42  ;;  %v845_v0 = vmin.f32 %v835_v59, %v844_v54 }
 0x39c   : > { %v859_v18 = vpop.permute.xlu1 %858  ;;  %v854_v60 = vand.u32 2147483647, %v853_v50 }
 0x39d   : > { %v861_v47 = vsel %vm860_vm0, %v857_v14, %v859_v18 }
 0x39e   : > { %v867_v23 = vpop.permute.xlu0 %866  ;;  %v863_v56 = vadd.f32 %v1743_v55, %v861_v47  ;;  %v855_v4 = vmin.f32 %v845_v0, %v854_v60 }
 0x3a0   : > { %v869_v26 = vpop.permute.xlu1 %868  ;;  %v864_v1 = vand.u32 2147483647, %v863_v56 }
 0x3a1   : > { %v871_v52 = vsel %vm870_vm2, %v867_v23, %v869_v26 }
 0x3a2   : > { %v877_v31 = vpop.permute.xlu0 %876  ;;  %v873_v61 = vadd.f32 %v1743_v55, %v871_v52  ;;  %v865_v10 = vmin.f32 %v855_v4, %v864_v1 }
 0x3a4   : > { %v879_v37 = vpop.permute.xlu1 %878  ;;  %v874_v5 = vand.u32 2147483647, %v873_v61 }
 0x3a5   : > { %v881_v58 = vsel %vm880_vm3, %v877_v31, %v879_v37 }
 0x3a6   : > { %v887_v46 = vpop.permute.xlu0 %886  ;;  %v883_v2 = vadd.f32 %v1743_v55, %v881_v58  ;;  %v875_v15 = vmin.f32 %v865_v10, %v874_v5 }
 0x3a8   : > { %v889_v51 = vpop.permute.xlu1 %888  ;;  %v884_v11 = vand.u32 2147483647, %v883_v2 }
 0x3a9   : > { %v891_v63 = vsel %vm890_vm4, %v887_v46, %v889_v51 }
 0x3aa   : > { %v897_v57 = vpop.permute.xlu0 %896  ;;  %v893_v6 = vadd.f32 %v1743_v55, %v891_v63  ;;  %v885_v20 = vmin.f32 %v875_v15, %v884_v11 }
 0x3ac   : > { %v899_v62 = vpop.permute.xlu1 %898  ;;  %v894_v16 = vand.u32 2147483647, %v893_v6 }
 0x3ad   : > { %v901_v12 = vsel %vm900_vm5, %v897_v57, %v899_v62 }
 0x3ae   : > { %v907_v3 = vpop.permute.xlu0 %906  ;;  %v903_v13 = vadd.f32 %v1743_v55, %v901_v12  ;;  %v895_v8 = vmin.f32 %v885_v20, %v894_v16 }
 0x3b0   : > { %v909_v7 = vpop.permute.xlu1 %908  ;;  %v904_v21 = vand.u32 2147483647, %v903_v13 }
 0x3b1   : > { %v911_v9 = vsel %vm910_vm6, %v907_v3, %v909_v7 }
 0x3b2   : > { %v917_v14 = vpop.permute.xlu0 %916  ;;  %v913_v17 = vadd.f32 %v1743_v55, %v911_v9  ;;  %v905_v26 = vmin.f32 %v895_v8, %v904_v21 }
 0x3b4   : > { %v919_v18 = vpop.permute.xlu1 %918  ;;  %v914_v36 = vand.u32 2147483647, %v913_v17 }
 0x3b5   : > { %v921_v19 = vsel %vm920_vm7, %v917_v14, %v919_v18 }
 0x3b6   : > { %v923_v22 = vadd.f32 %v1743_v55, %v921_v19  ;;  %v927_v23 = vpop.permute.xlu0 %926  ;;  %v915_v30 = vmin.f32 %v905_v26, %v914_v36 }
 0x3b8   : > { %v929_v24 = vpop.permute.xlu1 %928  ;;  %v924_v27 = vand.u32 2147483647, %v923_v22 }
 0x3b9   : > { %v931_v25 = vsel %vm930_vm8, %v927_v23, %v929_v24 }
 0x3ba   : > { %v933_v28 = vadd.f32 %v1743_v55, %v931_v25  ;;  %v937_v29 = vpop.permute.xlu0 %936  ;;  %v925_v34 = vmin.f32 %v915_v30, %v924_v27 }
 0x3bc   : > { %v934_v31 = vand.u32 2147483647, %v933_v28  ;;  %v939_v32 = vpop.permute.xlu1 %938 }
 0x3bd   : > { %v941_v33 = vsel %vm940_vm9, %v937_v29, %v939_v32 }
 0x3be   : > { %v943_v35 = vadd.f32 %v1743_v55, %v941_v33  ;;  %v935_v37 = vmin.f32 %v925_v34, %v934_v31 }
 0x3c0   : > { %v944_v42 = vand.u32 2147483647, %v943_v35 }
 0x3c2   : > { %v945_v43 = vmin.f32 %v935_v37, %v944_v42 }
 0x3c4   : > { %v946_v44 = vmul.f32 0.33333334, %v945_v43 }
 0x3c6   : > { %v947_v45 = vmin.f32 %v946_v44, 1.0 }
 0x3c8   : > { %948 = vst [vmem:[%s1548_s22 + $0x10] sm:$0xf] %v947_v45 }
 0x3c9 PF: > { %952 = sbr.rel (%p1265_p12) target bundleno = 1298 (0x512), region = 55  ;;  %v953_v46 = vld [vmem:[#allocation2 + $0x30] sm:$0xf] (!%p1265_p12)  ;;  %s1490_s25 = smov (!%p1265_p12), 1   ;;  %v1769_v47 = vld [vmem:[#allocation2 + $0x38] sm:$0xf] (!%p1265_p12) }
 0x3ca   : > { %966 = vrot.lane.b32.xlu1 (!%p1265_p12), %v953_v46, %s1490_s25  ;;  %s1491_s26 = smov (!%p1265_p12), 22   ;;  %s1492_s15 = smov (!%p1265_p12), 108   ;;  %vm992_vm10 = vcmask (!%p1265_p12), 891904   ;;  %vm983_vm11 = vcmask (!%p1265_p12), 883712   ;;  %vm1002_vm12 = vcmask (!%p1265_p12), 900096   ;;  %vm1012_vm13 = vcmask (!%p1265_p12), 908288  }
 0x3cb   : > { %957 = vrot.lane.b32.xlu0 (!%p1265_p12), %v953_v46, %s1491_s26  ;;  %s1493_s27 = smov (!%p1265_p12), 109   ;;  %s1494_s28 = smov (!%p1265_p12), 110   ;;  %vm1022_vm14 = vcmask (!%p1265_p12), 916480   ;;  %vm1032_vm15 = vcmask (!%p1265_p12), 924672   ;;  %vm1042_vm0 = vcmask (!%p1265_p12), 932864   ;;  %vm1052_vm2 = vcmask (!%p1265_p12), 941056  }
 0x3cc   : > { %s1495_s29 = smov (!%p1265_p12), 111   ;;  %s1496_s24 = smov (!%p1265_p12), 112   ;;  %vm1062_vm3 = vcmask (!%p1265_p12), 949248   ;;  %vm1072_vm4 = vcmask (!%p1265_p12), 957440   ;;  %vm1082_vm5 = vcmask (!%p1265_p12), 965632   ;;  %vm1092_vm6 = vcmask (!%p1265_p12), 973824  }
 0x3cd   : > { %s1497_s23 = smov (!%p1265_p12), 113   ;;  %s1498_s30 = smov (!%p1265_p12), 114   ;;  %vm1102_vm7 = vcmask (!%p1265_p12), 982016   ;;  %vm1112_vm8 = vcmask (!%p1265_p12), 990208   ;;  %vm1122_vm9 = vcmask (!%p1265_p12), 998400  }
 0x3ce   : > { %968 = vrot.lane.b32.xlu1 (!%p1265_p12), %v1769_v47, %s1490_s25  ;;  %s1499_s3 = smov (!%p1265_p12), 115   ;;  %s1500_s4 = smov (!%p1265_p12), 116  }
 0x3cf   : > { %959 = vrot.lane.b32.xlu0 (!%p1265_p12), %v1769_v47, %s1491_s26  ;;  %s1501_s5 = smov (!%p1265_p12), 117   ;;  %s1502_s6 = smov (!%p1265_p12), 118  }
 0x3d0   : > { %s1503_s7 = smov 119   ;;  %s1504_s8 = smov 120  }
 0x3d1   : > { %s1505_s9 = smov 121   ;;  %s1506_s10 = smov 122  }
 0x3d2   : > { %s1507_s11 = smov 123   ;;  %s1508_s12 = smov 124  }
 0x3d3   : > { %s1509_s13 = smov 125   ;;  %s1510_s0 = smov 126  }
 0x3d4   : > { %s1511_s16 = smov 127  }
 0x43c   : > { %v967_v39 = vpop.permute.xlu1 %966 }
 0x43d   : > { %v958_v55 = vpop.permute.xlu0 %957 }
 0x441   : > { %v960_v48 = vpop.permute.xlu0 %959 }
 0x442   : > { %v961_v49 = vsel %vm211_vm1, %v958_v55, %v960_v48  ;;  %v965_v50 = vsub.f32 %v224_v41, %v960_v48  ;;  %vm970_vm1 = vcmask 7168  }
 0x443   : > { %v1778_v51 = vsub.f32 %v223_v40, %v961_v49  ;;  %v969_v40 = vpop.permute.xlu1 %968 }
 0x444   : > { %981 = vrot.lane.b32.xlu1 %v965_v50, %s1492_s15  ;;  %v971_v0 = vsel %vm970_vm1, %v967_v39, %v969_v40  ;;  %vm1132_vm1 = vcmask 1006592  }
 0x445   : > { %979 = vrot.lane.b32.xlu0 %v1778_v51, %s1492_s15  ;;  %v973_v2 = vadd.f32 %v971_v0, %v1769_v47 }
 0x447   : > { %v974_v4 = vmul.f32 0.5, %v973_v2 }
 0x448   : > { %990 = vrot.lane.b32.xlu1 %v965_v50, %s1493_s27 }
 0x449   : > { %988 = vrot.lane.b32.xlu0 %v1778_v51, %s1493_s27  ;;  %v975_v7 = vadd.f32 %v974_v4, %v1568_v38 }
 0x44b   : > { %v1802_v13 = vadd.f32 -3.0, %v975_v7 }
 0x44c   : > { %1000 = vrot.lane.b32.xlu1 %v965_v50, %s1494_s28 }
 0x44d   : > { %998 = vrot.lane.b32.xlu0 %v1778_v51, %s1494_s28 }
 0x450   : > { %1010 = vrot.lane.b32.xlu1 %v965_v50, %s1495_s29 }
 0x451   : > { %1008 = vrot.lane.b32.xlu0 %v1778_v51, %s1495_s29 }
 0x454   : > { %1020 = vrot.lane.b32.xlu1 %v965_v50, %s1496_s24 }
 0x455   : > { %1018 = vrot.lane.b32.xlu0 %v1778_v51, %s1496_s24 }
 0x458   : > { %1030 = vrot.lane.b32.xlu1 %v965_v50, %s1497_s23 }
 0x459   : > { %1028 = vrot.lane.b32.xlu0 %v1778_v51, %s1497_s23 }
 0x45c   : > { %1040 = vrot.lane.b32.xlu1 %v965_v50, %s1498_s30 }
 0x45d   : > { %1038 = vrot.lane.b32.xlu0 %v1778_v51, %s1498_s30 }
 0x460   : > { %1050 = vrot.lane.b32.xlu1 %v965_v50, %s1499_s3 }
 0x461   : > { %1048 = vrot.lane.b32.xlu0 %v1778_v51, %s1499_s3 }
 0x464   : > { %1060 = vrot.lane.b32.xlu1 %v965_v50, %s1500_s4 }
 0x465   : > { %1058 = vrot.lane.b32.xlu0 %v1778_v51, %s1500_s4 }
 0x468   : > { %1070 = vrot.lane.b32.xlu1 %v965_v50, %s1501_s5 }
 0x469   : > { %1068 = vrot.lane.b32.xlu0 %v1778_v51, %s1501_s5 }
 0x46c   : > { %1080 = vrot.lane.b32.xlu1 %v965_v50, %s1502_s6 }
 0x46d   : > { %1078 = vrot.lane.b32.xlu0 %v1778_v51, %s1502_s6 }
 0x470   : > { %1090 = vrot.lane.b32.xlu1 %v965_v50, %s1503_s7 }
 0x471   : > { %1088 = vrot.lane.b32.xlu0 %v1778_v51, %s1503_s7 }
 0x474   : > { %1100 = vrot.lane.b32.xlu1 %v965_v50, %s1504_s8 }
 0x475   : > { %1098 = vrot.lane.b32.xlu0 %v1778_v51, %s1504_s8 }
 0x478   : > { %1110 = vrot.lane.b32.xlu1 %v965_v50, %s1505_s9 }
 0x479   : > { %1108 = vrot.lane.b32.xlu0 %v1778_v51, %s1505_s9 }
 0x47c   : > { %1120 = vrot.lane.b32.xlu1 %v965_v50, %s1506_s10 }
 0x47d   : > { %1118 = vrot.lane.b32.xlu0 %v1778_v51, %s1506_s10 }
 0x480   : > { %1130 = vrot.lane.b32.xlu1 %v965_v50, %s1507_s11 }
 0x481   : > { %1128 = vrot.lane.b32.xlu0 %v1778_v51, %s1507_s11 }
 0x484   : > { %1140 = vrot.lane.b32.xlu1 %v965_v50, %s1508_s12 }
 0x485   : > { %1138 = vrot.lane.b32.xlu0 %v1778_v51, %s1508_s12 }
 0x488   : > { %1150 = vrot.lane.b32.xlu1 %v965_v50, %s1509_s13 }
 0x489   : > { %1148 = vrot.lane.b32.xlu0 %v1778_v51, %s1509_s13 }
 0x48c   : > { %1160 = vrot.lane.b32.xlu1 %v965_v50, %s1510_s0 }
 0x48d   : > { %1158 = vrot.lane.b32.xlu0 %v1778_v51, %s1510_s0 }
 0x490   : > { %1170 = vrot.lane.b32.xlu1 %v965_v50, %s1511_s16 }
 0x491   : > { %1168 = vrot.lane.b32.xlu0 %v1778_v51, %s1511_s16 }
 0x4b6   : > { %v982_v41 = vpop.permute.xlu1 %981 }
 0x4b7   : > { %v980_v52 = vpop.permute.xlu0 %979 }
 0x4b8   : > { %v984_v15 = vsel %vm983_vm11, %v980_v52, %v982_v41  ;;  %vm1152_vm11 = vcmask 1022976  }
 0x4b9   : > { %v986_v20 = vadd.f32 %v1802_v13, %v984_v15 }
 0x4ba   : > { %v991_v53 = vpop.permute.xlu1 %990 }
 0x4bb   : > { %v989_v54 = vpop.permute.xlu0 %988  ;;  %v987_v25 = vand.u32 2147483647, %v986_v20 }
 0x4bc   : > { %v993_v10 = vsel %vm992_vm10, %v989_v54, %v991_v53  ;;  %vm1142_vm10 = vcmask 1014784  }
 0x4bd   : > { %v995_v17 = vadd.f32 %v1802_v13, %v993_v10 }
 0x4be   : > { %v1001_v56 = vpop.permute.xlu1 %1000 }
 0x4bf   : > { %v999_v57 = vpop.permute.xlu0 %998  ;;  %v996_v23 = vand.u32 2147483647, %v995_v17 }
 0x4c0   : > { %v1003_v16 = vsel %vm1002_vm12, %v999_v57, %v1001_v56  ;;  %vm1162_vm12 = vcmask 1031168  }
 0x4c1   : > { %v1005_v38 = vadd.f32 %v1802_v13, %v1003_v16  ;;  %v997_v30 = vmin.f32 %v987_v25, %v996_v23 }
 0x4c2   : > { %v1011_v58 = vpop.permute.xlu1 %1010 }
 0x4c3   : > { %v1009_v59 = vpop.permute.xlu0 %1008  ;;  %v1006_v26 = vand.u32 2147483647, %v1005_v38 }
 0x4c4   : > { %v1013_v18 = vsel %vm1012_vm13, %v1009_v59, %v1011_v58  ;;  %vm1172_vm13 = vcmask 1039360  }
 0x4c5   : > { %v1015_v8 = vadd.f32 %v1802_v13, %v1013_v18  ;;  %v1007_v35 = vmin.f32 %v997_v30, %v1006_v26 }
 0x4c6   : > { %v1021_v60 = vpop.permute.xlu1 %1020 }
 0x4c7   : > { %v1019_v61 = vpop.permute.xlu0 %1018  ;;  %v1016_v31 = vand.u32 2147483647, %v1015_v8 }
 0x4c8   : > { %v1023_v22 = vsel %vm1022_vm14, %v1019_v61, %v1021_v60 }
 0x4c9   : > { %v1025_v27 = vadd.f32 %v1802_v13, %v1023_v22  ;;  %v1017_v45 = vmin.f32 %v1007_v35, %v1016_v31 }
 0x4ca   : > { %v1031_v62 = vpop.permute.xlu1 %1030 }
 0x4cb   : > { %v1029_v63 = vpop.permute.xlu0 %1028  ;;  %v1026_v37 = vand.u32 2147483647, %v1025_v27 }
 0x4cc   : > { %v1033_v36 = vsel %vm1032_vm15, %v1029_v63, %v1031_v62 }
 0x4cd   : > { %v1035_v32 = vadd.f32 %v1802_v13, %v1033_v36  ;;  %v1027_v49 = vmin.f32 %v1017_v45, %v1026_v37 }
 0x4ce   : > { %v1041_v1 = vpop.permute.xlu1 %1040 }
 0x4cf   : > { %v1039_v3 = vpop.permute.xlu0 %1038  ;;  %v1036_v46 = vand.u32 2147483647, %v1035_v32 }
 0x4d0   : > { %v1043_v29 = vsel %vm1042_vm0, %v1039_v3, %v1041_v1 }
 0x4d1   : > { %v1045_v42 = vadd.f32 %v1802_v13, %v1043_v29  ;;  %v1037_v52 = vmin.f32 %v1027_v49, %v1036_v46  ;;  %v1178_v49 = vadd.f32 %v1802_v13, %v1778_v51 }
 0x4d2   : > { %v1051_v12 = vpop.permute.xlu1 %1050 }
 0x4d3   : > { %v1049_v5 = vpop.permute.xlu0 %1048  ;;  %v1046_v50 = vand.u32 2147483647, %v1045_v42 }
 0x4d4   : > { %v1053_v33 = vsel %vm1052_vm2, %v1049_v5, %v1051_v12 }
 0x4d5   : > { %v1055_v47 = vadd.f32 %v1802_v13, %v1053_v33  ;;  %v1047_v58 = vmin.f32 %v1037_v52, %v1046_v50 }
 0x4d6   : > { %v1061_v6 = vpop.permute.xlu1 %1060 }
 0x4d7   : > { %v1059_v9 = vpop.permute.xlu0 %1058  ;;  %v1056_v53 = vand.u32 2147483647, %v1055_v47 }
 0x4d8   : > { %v1063_v44 = vsel %vm1062_vm3, %v1059_v9, %v1061_v6 }
 0x4d9   : > { %v1065_v39 = vadd.f32 %v1802_v13, %v1063_v44  ;;  %v1057_v63 = vmin.f32 %v1047_v58, %v1056_v53 }
 0x4da   : > { %v1071_v11 = vpop.permute.xlu1 %1070 }
 0x4db   : > { %v1069_v14 = vpop.permute.xlu0 %1068  ;;  %v1066_v59 = vand.u32 2147483647, %v1065_v39 }
 0x4dc   : > { %v1073_v55 = vsel %vm1072_vm4, %v1069_v14, %v1071_v11 }
 0x4dd   : > { %v1075_v54 = vadd.f32 %v1802_v13, %v1073_v55  ;;  %v1067_v12 = vmin.f32 %v1057_v63, %v1066_v59 }
 0x4de   : > { %v1081_v19 = vpop.permute.xlu1 %1080 }
 0x4df   : > { %v1079_v21 = vpop.permute.xlu0 %1078  ;;  %v1076_v0 = vand.u32 2147483647, %v1075_v54 }
 0x4e0   : > { %v1083_v41 = vsel %vm1082_vm5, %v1079_v21, %v1081_v19 }
 0x4e1   : > { %v1085_v60 = vadd.f32 %v1802_v13, %v1083_v41  ;;  %v1077_v9 = vmin.f32 %v1067_v12, %v1076_v0  ;;  %v1179_v41 = vand.u32 2147483647, %v1178_v49 }
 0x4e2   : > { %v1091_v24 = vpop.permute.xlu1 %1090 }
 0x4e3   : > { %v1089_v28 = vpop.permute.xlu0 %1088  ;;  %v1086_v4 = vand.u32 2147483647, %v1085_v60 }
 0x4e4   : > { %v1093_v56 = vsel %vm1092_vm6, %v1089_v28, %v1091_v24 }
 0x4e5   : > { %v1095_v1 = vadd.f32 %v1802_v13, %v1093_v56  ;;  %v1087_v16 = vmin.f32 %v1077_v9, %v1086_v4 }
 0x4e6   : > { %v1101_v34 = vpop.permute.xlu1 %1100 }
 0x4e7   : > { %v1099_v43 = vpop.permute.xlu0 %1098  ;;  %v1096_v10 = vand.u32 2147483647, %v1095_v1 }
 0x4e8   : > { %v1103_v62 = vsel %vm1102_vm7, %v1099_v43, %v1101_v34 }
 0x4e9   : > { %v1105_v5 = vadd.f32 %v1802_v13, %v1103_v62  ;;  %v1097_v38 = vmin.f32 %v1087_v16, %v1096_v10 }
 0x4ea   : > { %v1111_v48 = vpop.permute.xlu1 %1110 }
 0x4eb   : > { %v1109_v40 = vpop.permute.xlu0 %1108  ;;  %v1106_v17 = vand.u32 2147483647, %v1105_v5 }
 0x4ec   : > { %v1113_v2 = vsel %vm1112_vm8, %v1109_v40, %v1111_v48 }
 0x4ed   : > { %v1115_v11 = vadd.f32 %v1802_v13, %v1113_v2  ;;  %v1107_v8 = vmin.f32 %v1097_v38, %v1106_v17 }
 0x4ee   : > { %v1121_v57 = vpop.permute.xlu1 %1120 }
 0x4ef   : > { %v1119_v61 = vpop.permute.xlu0 %1118  ;;  %v1116_v21 = vand.u32 2147483647, %v1115_v11 }
 0x4f0   : > { %v1123_v7 = vsel %vm1122_vm9, %v1119_v61, %v1121_v57 }
 0x4f1   : > { %v1125_v18 = vadd.f32 %v1802_v13, %v1123_v7  ;;  %v1117_v27 = vmin.f32 %v1107_v8, %v1116_v21 }
 0x4f2   : > { %v1131_v3 = vpop.permute.xlu1 %1130 }
 0x4f3   : > { %v1129_v6 = vpop.permute.xlu0 %1128  ;;  %v1126_v36 = vand.u32 2147483647, %v1125_v18 }
 0x4f4   : > { %v1133_v14 = vsel %vm1132_vm1, %v1129_v6, %v1131_v3 }
 0x4f5   : > { %v1135_v22 = vadd.f32 %v1802_v13, %v1133_v14  ;;  %v1127_v31 = vmin.f32 %v1117_v27, %v1126_v36 }
 0x4f6   : > { %v1141_v15 = vpop.permute.xlu1 %1140 }
 0x4f7   : > { %v1139_v19 = vpop.permute.xlu0 %1138  ;;  %v1136_v28 = vand.u32 2147483647, %v1135_v22 }
 0x4f8   : > { %v1143_v20 = vsel %vm1142_vm10, %v1139_v19, %v1141_v15 }
 0x4f9   : > { %v1145_v24 = vadd.f32 %v1802_v13, %v1143_v20  ;;  %v1137_v35 = vmin.f32 %v1127_v31, %v1136_v28 }
 0x4fa   : > { %v1151_v23 = vpop.permute.xlu1 %1150 }
 0x4fb   : > { %v1149_v25 = vpop.permute.xlu0 %1148  ;;  %v1146_v32 = vand.u32 2147483647, %v1145_v24 }
 0x4fc   : > { %v1153_v26 = vsel %vm1152_vm11, %v1149_v25, %v1151_v23 }
 0x4fd   : > { %v1155_v29 = vadd.f32 %v1802_v13, %v1153_v26  ;;  %v1147_v44 = vmin.f32 %v1137_v35, %v1146_v32 }
 0x4fe   : > { %v1161_v30 = vpop.permute.xlu1 %1160 }
 0x4ff   : > { %v1159_v33 = vpop.permute.xlu0 %1158  ;;  %v1156_v37 = vand.u32 2147483647, %v1155_v29 }
 0x500   : > { %v1163_v34 = vsel %vm1162_vm12, %v1159_v33, %v1161_v30 }
 0x501   : > { %v1165_v42 = vadd.f32 %v1802_v13, %v1163_v34  ;;  %v1157_v55 = vmin.f32 %v1147_v44, %v1156_v37 }
 0x502   : > { %v1171_v43 = vpop.permute.xlu1 %1170 }
 0x503   : > { %v1166_v45 = vand.u32 2147483647, %v1165_v42  ;;  %v1169_v46 = vpop.permute.xlu0 %1168 }
 0x504   : > { %v1173_v47 = vsel %vm1172_vm13, %v1169_v46, %v1171_v43 }
 0x505   : > { %v1175_v48 = vadd.f32 %v1802_v13, %v1173_v47  ;;  %v1167_v50 = vmin.f32 %v1157_v55, %v1166_v45 }
 0x507   : > { %v1176_v39 = vand.u32 2147483647, %v1175_v48 }
 0x509   : > { %v1177_v40 = vmin.f32 %v1167_v50, %v1176_v39 }
 0x50b   : > { %v1180_v52 = vmin.f32 %v1177_v40, %v1179_v41 }
 0x50d   : > { %v1181_v53 = vmul.f32 0.33333334, %v1180_v52 }
 0x50f   : > { %v1182_v54 = vmin.f32 %v1181_v53, 1.0 }
 0x511   : > { %1183 = vst [vmem:[%s1548_s22 + $0x10] sm:$0xf] %v1182_v54 }
 0x512 PF: > { %s18_s14 = sadd.s32 1, %s1414_s14  }
 0x513   : > { %p15_p0 = scmp.ge.s32.totalorder %s18_s14, 5  }
 0x515   :  { %17 = sbr.rel (!%p15_p0) target bundleno = 16 (0x10), region = 100 }

</bundles_post_ra>
